<compile_context>
chip_gen: v7x
topology: tpu7x:2x2x1
jax: 0.10.0
libtpu: 0.0.40
codegen_flags: <defaults>
</compile_context>

<pallas_src>
import math
import jax
import jax.numpy as jnp
from jax import lax
from jax.experimental import pallas as pl
from jax.experimental.pallas import tpu as pltpu


def _vmem_spec():
    # shapes here are tiny -> keep every operand fully resident in VMEM
    return pl.BlockSpec(memory_space=pltpu.MemorySpace.VMEM)


# ----------------------------------------------------------------------------- #
# Fused kernel: BiLSTM recurrence + LayerNorm + attention + fc + log_softmax
# ----------------------------------------------------------------------------- #
def fused_bilstm_attention_kernel(x_ref, wi_ref, wh_ref, b_ref,
                                  gamma_ref, beta_ref, fcw_ref, fcb_ref,
                                  out_ref, xs_f_ref, xs_b_ref):
    S, B, _ = x_ref.shape          # x_ref: (S, B, 2E)  = [emb_t | emb_{S-1-t}]
    U, H8 = wh_ref.shape           # wh_ref: (2H, 8H) block-diagonal over directions
    H = U // 2

    # (1) hoisted input projection: one MXU matmul for both directions and all
    #     timesteps; combined bias (b_ih + b_hh, both dirs) folded in here.
    x2d = x_ref[...].reshape(S * B, x_ref.shape[2])
    gx = (jnp.dot(x2d, wi_ref[...], preferred_element_type=jnp.float32)
          + b_ref[...]).reshape(S, B, H8)

    wh = wh_ref[...]

    # (2) serial recurrence, fully unrolled.  State is the concatenated
    #     [h_fwd | h_bwd] / [c_fwd | c_bwd] pair; one 128-lane-wide gate tensor.
    h = jnp.zeros((B, U), jnp.float32)
    c = jnp.zeros((B, U), jnp.float32)
    for t in range(S):
        gates = gx[t] + jnp.dot(h, wh, preferred_element_type=jnp.float32)   # (B, 8H)
        sg = jax.nn.sigmoid(gates[:, :6 * H])      # [i_f,i_b,f_f,f_b,o_f,o_b]
        gg = jnp.tanh(gates[:, 6 * H:])            # [g_f,g_b]
        i_g = sg[:, 0:2 * H]
        f_g = sg[:, 2 * H:4 * H]
        o_g = sg[:, 4 * H:6 * H]
        c = f_g * c + i_g * gg
        h = o_g * jnp.tanh(c)
        # forward half is aligned to time t, backward half to time S-1-t.
        # Store the full (B,2H) state into both alignment buffers; lane-select later.
        xs_f_ref[:, pl.ds(t, 1), :] = h.reshape(B, 1, U)
        xs_b_ref[:, pl.ds(S - 1 - t, 1), :] = h.reshape(B, 1, U)

    lane = lax.broadcasted_iota(jnp.int32, (B, S, U), 2)
    x = jnp.where(lane < H, xs_f_ref[...], xs_b_ref[...])       # (B, S, U) BiLSTM output

    # (3) LayerNorm over the feature dim (eps = 1e-5, PyTorch default)
    mean = jnp.mean(x, axis=-1, keepdims=True)
    var = jnp.mean((x - mean) ** 2, axis=-1, keepdims=True)
    xln = (x - mean) * lax.rsqrt(var + 1e-5) * gamma_ref[...] + beta_ref[...]

    # TODO(synk): dropout treated as identity (inference / eval mode).
    # (4) attention_net, algebraically collapsed:
    #     context = sum_q softmax_k(q.k/sqrt(U)) @ x == (sum_q alpha) @ x
    scores = jnp.einsum('bqu,bku->bqk', xln, xln,
                        preferred_element_type=jnp.float32) / math.sqrt(float(U))
    m = jnp.max(scores, axis=-1, keepdims=True)
    e = jnp.exp(scores - m)
    alpha = e / jnp.sum(e, axis=-1, keepdims=True)
    alpha_sum = jnp.sum(alpha, axis=1)                           # (B, S)
    context = jnp.sum(alpha_sum[:, :, None] * xln, axis=1)       # (B, U)

    # (5) fc + log_softmax
    logits = (jnp.dot(context, fcw_ref[...], preferred_element_type=jnp.float32)
              + fcb_ref[...])                                    # (B, L)
    lm = jnp.max(logits, axis=-1, keepdims=True)
    lse = jnp.log(jnp.sum(jnp.exp(logits - lm), axis=-1, keepdims=True)) + lm
    out_ref[...] = logits - lse


# ----------------------------------------------------------------------------- #
# Wrapper: embedding gather (glue), weight merging/pre-transposition, one call
# ----------------------------------------------------------------------------- #
def _gate_rows(w, H):
    # PyTorch packs LSTM parameters row-wise as (i, f, g, o)
    return w[0:H], w[H:2 * H], w[2 * H:3 * H], w[3 * H:4 * H]


def _build_merged_weights(p):
    H = p['w_hh_f'].shape[1]
    E = p['w_ih_f'].shape[1]

    wi_f_i, wi_f_f, wi_f_g, wi_f_o = _gate_rows(p['w_ih_f'], H)
    wi_b_i, wi_b_f, wi_b_g, wi_b_o = _gate_rows(p['w_ih_b'], H)
    wh_f_i, wh_f_f, wh_f_g, wh_f_o = _gate_rows(p['w_hh_f'], H)
    wh_b_i, wh_b_f, wh_b_g, wh_b_o = _gate_rows(p['w_hh_b'], H)
    bf_i, bf_f, bf_g, bf_o = _gate_rows(p['b_ih_f'] + p['b_hh_f'], H)
    bb_i, bb_f, bb_g, bb_o = _gate_rows(p['b_ih_b'] + p['b_hh_b'], H)

    zE = jnp.zeros((E, H), jnp.float32)
    zH = jnp.zeros((H, H), jnp.float32)

    # merged gate-column order (width H each): [i_f, i_b, f_f, f_b, o_f, o_b, g_f, g_b]
    wi_top = jnp.concatenate([wi_f_i.T, zE, wi_f_f.T, zE, wi_f_o.T, zE, wi_f_g.T, zE], axis=1)
    wi_bot = jnp.concatenate([zE, wi_b_i.T, zE, wi_b_f.T, zE, wi_b_o.T, zE, wi_b_g.T], axis=1)
    w_i_all = jnp.concatenate([wi_top, wi_bot], axis=0)          # (2E, 8H)

    wh_top = jnp.concatenate([wh_f_i.T, zH, wh_f_f.T, zH, wh_f_o.T, zH, wh_f_g.T, zH], axis=1)
    wh_bot = jnp.concatenate([zH, wh_b_i.T, zH, wh_b_f.T, zH, wh_b_o.T, zH, wh_b_g.T], axis=1)
    w_h_all = jnp.concatenate([wh_top, wh_bot], axis=0)          # (2H, 8H)

    b_all = jnp.concatenate([bf_i, bb_i, bf_f, bb_f, bf_o, bb_o, bf_g, bb_g]).reshape(1, 8 * H)
    return w_i_all, w_h_all, b_all


def bilstm_attention_forward(input_ids, p):
    emb = p['embedding'][input_ids]                  # embedding gather (glue, plain JAX)
    B, S, E = emb.shape
    H = p['w_hh_f'].shape[1]
    U = 2 * H
    L = p['fc_w'].shape[0]

    w_i_all, w_h_all, b_all = _build_merged_weights(p)

    # time-major input; concat forward- and time-reversed embeddings feature-wise so
    # one matmul against the block-structured (2E, 8H) weight yields both directions.
    emb_tm = jnp.transpose(emb, (1, 0, 2)).astype(jnp.float32)         # (S, B, E)
    x_cat = jnp.concatenate([emb_tm, emb_tm[::-1]], axis=-1)           # (S, B, 2E)

    return pl.pallas_call(
        fused_bilstm_attention_kernel,
        out_shape=jax.ShapeDtypeStruct((B, L), jnp.float32),
        in_specs=[_vmem_spec()] * 8,
        out_specs=_vmem_spec(),
        scratch_shapes=[pltpu.VMEM((B, S, U), jnp.float32),
                        pltpu.VMEM((B, S, U), jnp.float32)],
    )(x_cat, w_i_all, w_h_all, b_all,
      p['ln_gamma'].reshape(1, U), p['ln_beta'].reshape(1, U),
      p['fc_w'].T, p['fc_b'].reshape(1, L))


# ----------------------------------------------------------------------------- #
# Pure-JAX reference (for correctness check only)
# ----------------------------------------------------------------------------- #
def reference_forward(input_ids, p):
    emb = p['embedding'][input_ids]
    B, S, E = emb.shape
    H = p['w_hh_f'].shape[1]

    def run_dir(xs, wi, wh, bi, bh):
        def step(carry, x_t):
            h, c = carry
            gates = x_t @ wi.T + bi + h @ wh.T + bh
            i = jax.nn.sigmoid(gates[:, :H])
            f = jax.nn.sigmoid(gates[:, H:2 * H])
            g = jnp.tanh(gates[:, 2 * H:3 * H])
            o = jax.nn.sigmoid(gates[:, 3 * H:])
            c = f * c + i * g
            h = o * jnp.tanh(c)
            return (h, c), h
        zeros = jnp.zeros((B, H), jnp.float32)
        _, hs = lax.scan(step, (zeros, zeros), jnp.swapaxes(xs, 0, 1))
        return jnp.swapaxes(hs, 0, 1)

    out_f = run_dir(emb, p['w_ih_f'], p['w_hh_f'], p['b_ih_f'], p['b_hh_f'])
    out_b = run_dir(emb[:, ::-1], p['w_ih_b'], p['w_hh_b'], p['b_ih_b'], p['b_hh_b'])[:, ::-1]
    out = jnp.concatenate([out_f, out_b], axis=-1)
    mean = out.mean(-1, keepdims=True)
    var = ((out - mean) ** 2).mean(-1, keepdims=True)
    out = (out - mean) / jnp.sqrt(var + 1e-5) * p['ln_gamma'] + p['ln_beta']
    U = out.shape[-1]
    scores = jnp.einsum('bqu,bku->bqk', out, out) / math.sqrt(float(U))
    alpha = jax.nn.softmax(scores, axis=-1)
    ctx = jnp.einsum('bqk,bku->bqu', alpha, out).sum(1)
    logits = ctx @ p['fc_w'].T + p['fc_b']
    return jax.nn.log_softmax(logits, axis=-1)


def init_params(key, vocab, E, H, L):
    ks = jax.random.split(key, 11)
    lim = 1.0 / math.sqrt(H)
    limf = 1.0 / math.sqrt(2 * H)

    def u(k, shape, l):
        return jax.random.uniform(k, shape, jnp.float32, -l, l)

    return dict(
        embedding=jax.random.normal(ks[0], (vocab, E), jnp.float32),
        w_ih_f=u(ks[1], (4 * H, E), lim), w_hh_f=u(ks[2], (4 * H, H), lim),
        b_ih_f=u(ks[3], (4 * H,), lim), b_hh_f=u(ks[4], (4 * H,), lim),
        w_ih_b=u(ks[5], (4 * H, E), lim), w_hh_b=u(ks[6], (4 * H, H), lim),
        b_ih_b=u(ks[7], (4 * H,), lim), b_hh_b=u(ks[8], (4 * H,), lim),
        ln_gamma=jnp.ones((2 * H,), jnp.float32),
        ln_beta=jnp.zeros((2 * H,), jnp.float32),
        fc_w=u(ks[9], (L, 2 * H), limf),
        fc_b=u(ks[10], (L,), limf),
    )


if __name__ == "__main__":
    # config: flag='char', char_num=50, embed_dim=16, unit=32 (-> hidden 16 per dir),
    #         label_num=4, dropout inactive (eval); batch=2, seq_len=8
    B, S, VOCAB, E, H, L = 2, 8, 50, 16, 16, 4

    key = jax.random.PRNGKey(0)
    k_param, k_ids = jax.random.split(key)
    params = init_params(k_param, VOCAB, E, H, L)
    input_ids = jax.random.randint(k_ids, (B, S), 0, VOCAB, dtype=jnp.int32)

    out = jax.block_until_ready(bilstm_attention_forward(input_ids, params))
    ref = jax.block_until_ready(reference_forward(input_ids, params))

    assert out.shape == (B, L), out.shape
    assert jnp.allclose(out, ref, atol=1e-3, rtol=1e-3), (out, ref)
    print("KERNEL_OK")
</pallas_src>

<mosaic_0001>
module attributes {stable_mosaic.version = 11 : i64} {
  func.func @fused_bilstm_attention_kernel(%arg0: memref<8x2x32xf32, #tpu.memory_space<vmem>>, %arg1: memref<32x128xf32, #tpu.memory_space<vmem>>, %arg2: memref<32x128xf32, #tpu.memory_space<vmem>>, %arg3: memref<1x128xf32, #tpu.memory_space<vmem>>, %arg4: memref<1x32xf32, #tpu.memory_space<vmem>>, %arg5: memref<1x32xf32, #tpu.memory_space<vmem>>, %arg6: memref<32x4xf32, #tpu.memory_space<vmem>>, %arg7: memref<1x4xf32, #tpu.memory_space<vmem>>, %arg8: memref<2x4xf32, #tpu.memory_space<vmem>>, %arg9: memref<2x8x32xf32, #tpu.memory_space<vmem>>, %arg10: memref<2x8x32xf32, #tpu.memory_space<vmem>>) attributes {dimension_semantics = [], scalar_prefetch = 0 : i64, scratch_operands = 2 : i64, tpu.core_type = #tpu.core_type<tc>} {
    %c0 = arith.constant 0 : index
    %c0_0 = arith.constant 0 : index
    %c0_1 = arith.constant 0 : index
    %0 = vector.load %arg0[%c0, %c0_0, %c0_1] : memref<8x2x32xf32, #tpu.memory_space<vmem>>, vector<8x2x32xf32>
    %1 = vector.shape_cast %0 : vector<8x2x32xf32> to vector<16x32xf32>
    %c0_2 = arith.constant 0 : index
    %c0_3 = arith.constant 0 : index
    %2 = vector.load %arg1[%c0_2, %c0_3] : memref<32x128xf32, #tpu.memory_space<vmem>>, vector<32x128xf32>
    %cst = arith.constant dense<0.000000e+00> : vector<16x128xf32>
    %3 = tpu.matmul %1, %2, %cst {dimension_numbers = #tpu.dot_dimension_numbers<[1], [0], [0], [1], [0, 0, 1, 1], [], []>} : vector<16x32xf32>, vector<32x128xf32>, vector<16x128xf32> -> vector<16x128xf32>
    %c0_4 = arith.constant 0 : index
    %c0_5 = arith.constant 0 : index
    %4 = vector.load %arg3[%c0_4, %c0_5] : memref<1x128xf32, #tpu.memory_space<vmem>>, vector<1x128xf32>
    %5 = vector.broadcast %4 : vector<1x128xf32> to vector<16x128xf32>
    %6 = arith.addf %3, %5 : vector<16x128xf32>
    %7 = vector.shape_cast %6 : vector<16x128xf32> to vector<8x2x128xf32>
    %c0_6 = arith.constant 0 : index
    %c0_7 = arith.constant 0 : index
    %8 = vector.load %arg2[%c0_6, %c0_7] : memref<32x128xf32, #tpu.memory_space<vmem>>, vector<32x128xf32>
    %cst_8 = arith.constant 0.000000e+00 : f32
    %9 = vector.broadcast %cst_8 : f32 to vector<2x32xf32>
    %cst_9 = arith.constant 0.000000e+00 : f32
    %10 = vector.broadcast %cst_9 : f32 to vector<2x32xf32>
    %11 = vector.extract_strided_slice %7 {offsets = [0, 0, 0], sizes = [1, 2, 128], strides = [1, 1, 1]} : vector<8x2x128xf32> to vector<1x2x128xf32>
    %12 = vector.shape_cast %11 : vector<1x2x128xf32> to vector<2x128xf32>
    %cst_10 = arith.constant dense<0.000000e+00> : vector<2x128xf32>
    %13 = tpu.matmul %9, %8, %cst_10 {dimension_numbers = #tpu.dot_dimension_numbers<[1], [0], [0], [1], [0, 0, 1, 1], [], []>} : vector<2x32xf32>, vector<32x128xf32>, vector<2x128xf32> -> vector<2x128xf32>
    %14 = arith.addf %12, %13 : vector<2x128xf32>
    %15 = vector.extract_strided_slice %14 {offsets = [0, 0], sizes = [2, 96], strides = [1, 1]} : vector<2x128xf32> to vector<2x96xf32>
    %16 = arith.negf %15 : vector<2x96xf32>
    %17 = math.exp %16 : vector<2x96xf32>
    %cst_11 = arith.constant 1.000000e+00 : f32
    %18 = vector.broadcast %cst_11 : f32 to vector<2x96xf32>
    %19 = arith.addf %18, %17 : vector<2x96xf32>
    %20 = arith.divf %18, %19 : vector<2x96xf32>
    %21 = vector.extract_strided_slice %14 {offsets = [0, 96], sizes = [2, 32], strides = [1, 1]} : vector<2x128xf32> to vector<2x32xf32>
    %22 = math.tanh %21 : vector<2x32xf32>
    %23 = vector.extract_strided_slice %20 {offsets = [0, 0], sizes = [2, 32], strides = [1, 1]} : vector<2x96xf32> to vector<2x32xf32>
    %24 = vector.extract_strided_slice %20 {offsets = [0, 32], sizes = [2, 32], strides = [1, 1]} : vector<2x96xf32> to vector<2x32xf32>
    %25 = vector.extract_strided_slice %20 {offsets = [0, 64], sizes = [2, 32], strides = [1, 1]} : vector<2x96xf32> to vector<2x32xf32>
    %26 = arith.mulf %24, %10 : vector<2x32xf32>
    %27 = arith.mulf %23, %22 : vector<2x32xf32>
    %28 = arith.addf %26, %27 : vector<2x32xf32>
    %29 = math.tanh %28 : vector<2x32xf32>
    %30 = arith.mulf %25, %29 : vector<2x32xf32>
    %31 = vector.shape_cast %30 : vector<2x32xf32> to vector<2x1x32xf32>
    %c0_12 = arith.constant 0 : index
    %c0_13 = arith.constant 0 : index
    %c0_14 = arith.constant 0 : index
    %32 = vector.load %arg9[%c0_12, %c0_13, %c0_14] : memref<2x8x32xf32, #tpu.memory_space<vmem>>, vector<2x1x32xf32>
    tpu.vector_store %arg9[%c0_12, %c0_13, %c0_14], %31 {strides = array<i32>} : memref<2x8x32xf32, #tpu.memory_space<vmem>>, vector<2x1x32xf32>,
    %33 = vector.shape_cast %30 : vector<2x32xf32> to vector<2x1x32xf32>
    %c0_15 = arith.constant 0 : index
    %c7 = arith.constant 7 : index
    %c0_16 = arith.constant 0 : index
    %34 = vector.load %arg10[%c0_15, %c7, %c0_16] : memref<2x8x32xf32, #tpu.memory_space<vmem>>, vector<2x1x32xf32>
    tpu.vector_store %arg10[%c0_15, %c7, %c0_16], %33 {strides = array<i32>} : memref<2x8x32xf32, #tpu.memory_space<vmem>>, vector<2x1x32xf32>,
    %35 = vector.extract_strided_slice %7 {offsets = [1, 0, 0], sizes = [1, 2, 128], strides = [1, 1, 1]} : vector<8x2x128xf32> to vector<1x2x128xf32>
    %36 = vector.shape_cast %35 : vector<1x2x128xf32> to vector<2x128xf32>
    %cst_17 = arith.constant dense<0.000000e+00> : vector<2x128xf32>
    %37 = tpu.matmul %30, %8, %cst_17 {dimension_numbers = #tpu.dot_dimension_numbers<[1], [0], [0], [1], [0, 0, 1, 1], [], []>} : vector<2x32xf32>, vector<32x128xf32>, vector<2x128xf32> -> vector<2x128xf32>
    %38 = arith.addf %36, %37 : vector<2x128xf32>
    %39 = vector.extract_strided_slice %38 {offsets = [0, 0], sizes = [2, 96], strides = [1, 1]} : vector<2x128xf32> to vector<2x96xf32>
    %40 = arith.negf %39 : vector<2x96xf32>
    %41 = math.exp %40 : vector<2x96xf32>
    %cst_18 = arith.constant 1.000000e+00 : f32
    %42 = vector.broadcast %cst_18 : f32 to vector<2x96xf32>
    %43 = arith.addf %42, %41 : vector<2x96xf32>
    %44 = arith.divf %42, %43 : vector<2x96xf32>
    %45 = vector.extract_strided_slice %38 {offsets = [0, 96], sizes = [2, 32], strides = [1, 1]} : vector<2x128xf32> to vector<2x32xf32>
    %46 = math.tanh %45 : vector<2x32xf32>
    %47 = vector.extract_strided_slice %44 {offsets = [0, 0], sizes = [2, 32], strides = [1, 1]} : vector<2x96xf32> to vector<2x32xf32>
    %48 = vector.extract_strided_slice %44 {offsets = [0, 32], sizes = [2, 32], strides = [1, 1]} : vector<2x96xf32> to vector<2x32xf32>
    %49 = vector.extract_strided_slice %44 {offsets = [0, 64], sizes = [2, 32], strides = [1, 1]} : vector<2x96xf32> to vector<2x32xf32>
    %50 = arith.mulf %48, %28 : vector<2x32xf32>
    %51 = arith.mulf %47, %46 : vector<2x32xf32>
    %52 = arith.addf %50, %51 : vector<2x32xf32>
    %53 = math.tanh %52 : vector<2x32xf32>
    %54 = arith.mulf %49, %53 : vector<2x32xf32>
    %55 = vector.shape_cast %54 : vector<2x32xf32> to vector<2x1x32xf32>
    %c0_19 = arith.constant 0 : index
    %c1 = arith.constant 1 : index
    %c0_20 = arith.constant 0 : index
    %56 = vector.load %arg9[%c0_19, %c1, %c0_20] : memref<2x8x32xf32, #tpu.memory_space<vmem>>, vector<2x1x32xf32>
    tpu.vector_store %arg9[%c0_19, %c1, %c0_20], %55 {strides = array<i32>} : memref<2x8x32xf32, #tpu.memory_space<vmem>>, vector<2x1x32xf32>,
    %57 = vector.shape_cast %54 : vector<2x32xf32> to vector<2x1x32xf32>
    %c0_21 = arith.constant 0 : index
    %c6 = arith.constant 6 : index
    %c0_22 = arith.constant 0 : index
    %58 = vector.load %arg10[%c0_21, %c6, %c0_22] : memref<2x8x32xf32, #tpu.memory_space<vmem>>, vector<2x1x32xf32>
    tpu.vector_store %arg10[%c0_21, %c6, %c0_22], %57 {strides = array<i32>} : memref<2x8x32xf32, #tpu.memory_space<vmem>>, vector<2x1x32xf32>,
    %59 = vector.extract_strided_slice %7 {offsets = [2, 0, 0], sizes = [1, 2, 128], strides = [1, 1, 1]} : vector<8x2x128xf32> to vector<1x2x128xf32>
    %60 = vector.shape_cast %59 : vector<1x2x128xf32> to vector<2x128xf32>
    %cst_23 = arith.constant dense<0.000000e+00> : vector<2x128xf32>
    %61 = tpu.matmul %54, %8, %cst_23 {dimension_numbers = #tpu.dot_dimension_numbers<[1], [0], [0], [1], [0, 0, 1, 1], [], []>} : vector<2x32xf32>, vector<32x128xf32>, vector<2x128xf32> -> vector<2x128xf32>
    %62 = arith.addf %60, %61 : vector<2x128xf32>
    %63 = vector.extract_strided_slice %62 {offsets = [0, 0], sizes = [2, 96], strides = [1, 1]} : vector<2x128xf32> to vector<2x96xf32>
    %64 = arith.negf %63 : vector<2x96xf32>
    %65 = math.exp %64 : vector<2x96xf32>
    %cst_24 = arith.constant 1.000000e+00 : f32
    %66 = vector.broadcast %cst_24 : f32 to vector<2x96xf32>
    %67 = arith.addf %66, %65 : vector<2x96xf32>
    %68 = arith.divf %66, %67 : vector<2x96xf32>
    %69 = vector.extract_strided_slice %62 {offsets = [0, 96], sizes = [2, 32], strides = [1, 1]} : vector<2x128xf32> to vector<2x32xf32>
    %70 = math.tanh %69 : vector<2x32xf32>
    %71 = vector.extract_strided_slice %68 {offsets = [0, 0], sizes = [2, 32], strides = [1, 1]} : vector<2x96xf32> to vector<2x32xf32>
    %72 = vector.extract_strided_slice %68 {offsets = [0, 32], sizes = [2, 32], strides = [1, 1]} : vector<2x96xf32> to vector<2x32xf32>
    %73 = vector.extract_strided_slice %68 {offsets = [0, 64], sizes = [2, 32], strides = [1, 1]} : vector<2x96xf32> to vector<2x32xf32>
    %74 = arith.mulf %72, %52 : vector<2x32xf32>
    %75 = arith.mulf %71, %70 : vector<2x32xf32>
    %76 = arith.addf %74, %75 : vector<2x32xf32>
    %77 = math.tanh %76 : vector<2x32xf32>
    %78 = arith.mulf %73, %77 : vector<2x32xf32>
    %79 = vector.shape_cast %78 : vector<2x32xf32> to vector<2x1x32xf32>
    %c0_25 = arith.constant 0 : index
    %c2 = arith.constant 2 : index
    %c0_26 = arith.constant 0 : index
    %80 = vector.load %arg9[%c0_25, %c2, %c0_26] : memref<2x8x32xf32, #tpu.memory_space<vmem>>, vector<2x1x32xf32>
    tpu.vector_store %arg9[%c0_25, %c2, %c0_26], %79 {strides = array<i32>} : memref<2x8x32xf32, #tpu.memory_space<vmem>>, vector<2x1x32xf32>,
    %81 = vector.shape_cast %78 : vector<2x32xf32> to vector<2x1x32xf32>
    %c0_27 = arith.constant 0 : index
    %c5 = arith.constant 5 : index
    %c0_28 = arith.constant 0 : index
    %82 = vector.load %arg10[%c0_27, %c5, %c0_28] : memref<2x8x32xf32, #tpu.memory_space<vmem>>, vector<2x1x32xf32>
    tpu.vector_store %arg10[%c0_27, %c5, %c0_28], %81 {strides = array<i32>} : memref<2x8x32xf32, #tpu.memory_space<vmem>>, vector<2x1x32xf32>,
    %83 = vector.extract_strided_slice %7 {offsets = [3, 0, 0], sizes = [1, 2, 128], strides = [1, 1, 1]} : vector<8x2x128xf32> to vector<1x2x128xf32>
    %84 = vector.shape_cast %83 : vector<1x2x128xf32> to vector<2x128xf32>
    %cst_29 = arith.constant dense<0.000000e+00> : vector<2x128xf32>
    %85 = tpu.matmul %78, %8, %cst_29 {dimension_numbers = #tpu.dot_dimension_numbers<[1], [0], [0], [1], [0, 0, 1, 1], [], []>} : vector<2x32xf32>, vector<32x128xf32>, vector<2x128xf32> -> vector<2x128xf32>
    %86 = arith.addf %84, %85 : vector<2x128xf32>
    %87 = vector.extract_strided_slice %86 {offsets = [0, 0], sizes = [2, 96], strides = [1, 1]} : vector<2x128xf32> to vector<2x96xf32>
    %88 = arith.negf %87 : vector<2x96xf32>
    %89 = math.exp %88 : vector<2x96xf32>
    %cst_30 = arith.constant 1.000000e+00 : f32
    %90 = vector.broadcast %cst_30 : f32 to vector<2x96xf32>
    %91 = arith.addf %90, %89 : vector<2x96xf32>
    %92 = arith.divf %90, %91 : vector<2x96xf32>
    %93 = vector.extract_strided_slice %86 {offsets = [0, 96], sizes = [2, 32], strides = [1, 1]} : vector<2x128xf32> to vector<2x32xf32>
    %94 = math.tanh %93 : vector<2x32xf32>
    %95 = vector.extract_strided_slice %92 {offsets = [0, 0], sizes = [2, 32], strides = [1, 1]} : vector<2x96xf32> to vector<2x32xf32>
    %96 = vector.extract_strided_slice %92 {offsets = [0, 32], sizes = [2, 32], strides = [1, 1]} : vector<2x96xf32> to vector<2x32xf32>
    %97 = vector.extract_strided_slice %92 {offsets = [0, 64], sizes = [2, 32], strides = [1, 1]} : vector<2x96xf32> to vector<2x32xf32>
    %98 = arith.mulf %96, %76 : vector<2x32xf32>
    %99 = arith.mulf %95, %94 : vector<2x32xf32>
    %100 = arith.addf %98, %99 : vector<2x32xf32>
    %101 = math.tanh %100 : vector<2x32xf32>
    %102 = arith.mulf %97, %101 : vector<2x32xf32>
    %103 = vector.shape_cast %102 : vector<2x32xf32> to vector<2x1x32xf32>
    %c0_31 = arith.constant 0 : index
    %c3 = arith.constant 3 : index
    %c0_32 = arith.constant 0 : index
    %104 = vector.load %arg9[%c0_31, %c3, %c0_32] : memref<2x8x32xf32, #tpu.memory_space<vmem>>, vector<2x1x32xf32>
    tpu.vector_store %arg9[%c0_31, %c3, %c0_32], %103 {strides = array<i32>} : memref<2x8x32xf32, #tpu.memory_space<vmem>>, vector<2x1x32xf32>,
    %105 = vector.shape_cast %102 : vector<2x32xf32> to vector<2x1x32xf32>
    %c0_33 = arith.constant 0 : index
    %c4 = arith.constant 4 : index
    %c0_34 = arith.constant 0 : index
    %106 = vector.load %arg10[%c0_33, %c4, %c0_34] : memref<2x8x32xf32, #tpu.memory_space<vmem>>, vector<2x1x32xf32>
    tpu.vector_store %arg10[%c0_33, %c4, %c0_34], %105 {strides = array<i32>} : memref<2x8x32xf32, #tpu.memory_space<vmem>>, vector<2x1x32xf32>,
    %107 = vector.extract_strided_slice %7 {offsets = [4, 0, 0], sizes = [1, 2, 128], strides = [1, 1, 1]} : vector<8x2x128xf32> to vector<1x2x128xf32>
    %108 = vector.shape_cast %107 : vector<1x2x128xf32> to vector<2x128xf32>
    %cst_35 = arith.constant dense<0.000000e+00> : vector<2x128xf32>
    %109 = tpu.matmul %102, %8, %cst_35 {dimension_numbers = #tpu.dot_dimension_numbers<[1], [0], [0], [1], [0, 0, 1, 1], [], []>} : vector<2x32xf32>, vector<32x128xf32>, vector<2x128xf32> -> vector<2x128xf32>
    %110 = arith.addf %108, %109 : vector<2x128xf32>
    %111 = vector.extract_strided_slice %110 {offsets = [0, 0], sizes = [2, 96], strides = [1, 1]} : vector<2x128xf32> to vector<2x96xf32>
    %112 = arith.negf %111 : vector<2x96xf32>
    %113 = math.exp %112 : vector<2x96xf32>
    %cst_36 = arith.constant 1.000000e+00 : f32
    %114 = vector.broadcast %cst_36 : f32 to vector<2x96xf32>
    %115 = arith.addf %114, %113 : vector<2x96xf32>
    %116 = arith.divf %114, %115 : vector<2x96xf32>
    %117 = vector.extract_strided_slice %110 {offsets = [0, 96], sizes = [2, 32], strides = [1, 1]} : vector<2x128xf32> to vector<2x32xf32>
    %118 = math.tanh %117 : vector<2x32xf32>
    %119 = vector.extract_strided_slice %116 {offsets = [0, 0], sizes = [2, 32], strides = [1, 1]} : vector<2x96xf32> to vector<2x32xf32>
    %120 = vector.extract_strided_slice %116 {offsets = [0, 32], sizes = [2, 32], strides = [1, 1]} : vector<2x96xf32> to vector<2x32xf32>
    %121 = vector.extract_strided_slice %116 {offsets = [0, 64], sizes = [2, 32], strides = [1, 1]} : vector<2x96xf32> to vector<2x32xf32>
    %122 = arith.mulf %120, %100 : vector<2x32xf32>
    %123 = arith.mulf %119, %118 : vector<2x32xf32>
    %124 = arith.addf %122, %123 : vector<2x32xf32>
    %125 = math.tanh %124 : vector<2x32xf32>
    %126 = arith.mulf %121, %125 : vector<2x32xf32>
    %127 = vector.shape_cast %126 : vector<2x32xf32> to vector<2x1x32xf32>
    %c0_37 = arith.constant 0 : index
    %c4_38 = arith.constant 4 : index
    %c0_39 = arith.constant 0 : index
    %128 = vector.load %arg9[%c0_37, %c4_38, %c0_39] : memref<2x8x32xf32, #tpu.memory_space<vmem>>, vector<2x1x32xf32>
    tpu.vector_store %arg9[%c0_37, %c4_38, %c0_39], %127 {strides = array<i32>} : memref<2x8x32xf32, #tpu.memory_space<vmem>>, vector<2x1x32xf32>,
    %129 = vector.shape_cast %126 : vector<2x32xf32> to vector<2x1x32xf32>
    %c0_40 = arith.constant 0 : index
    %c3_41 = arith.constant 3 : index
    %c0_42 = arith.constant 0 : index
    %130 = vector.load %arg10[%c0_40, %c3_41, %c0_42] : memref<2x8x32xf32, #tpu.memory_space<vmem>>, vector<2x1x32xf32>
    tpu.vector_store %arg10[%c0_40, %c3_41, %c0_42], %129 {strides = array<i32>} : memref<2x8x32xf32, #tpu.memory_space<vmem>>, vector<2x1x32xf32>,
    %131 = vector.extract_strided_slice %7 {offsets = [5, 0, 0], sizes = [1, 2, 128], strides = [1, 1, 1]} : vector<8x2x128xf32> to vector<1x2x128xf32>
    %132 = vector.shape_cast %131 : vector<1x2x128xf32> to vector<2x128xf32>
    %cst_43 = arith.constant dense<0.000000e+00> : vector<2x128xf32>
    %133 = tpu.matmul %126, %8, %cst_43 {dimension_numbers = #tpu.dot_dimension_numbers<[1], [0], [0], [1], [0, 0, 1, 1], [], []>} : vector<2x32xf32>, vector<32x128xf32>, vector<2x128xf32> -> vector<2x128xf32>
    %134 = arith.addf %132, %133 : vector<2x128xf32>
    %135 = vector.extract_strided_slice %134 {offsets = [0, 0], sizes = [2, 96], strides = [1, 1]} : vector<2x128xf32> to vector<2x96xf32>
    %136 = arith.negf %135 : vector<2x96xf32>
    %137 = math.exp %136 : vector<2x96xf32>
    %cst_44 = arith.constant 1.000000e+00 : f32
    %138 = vector.broadcast %cst_44 : f32 to vector<2x96xf32>
    %139 = arith.addf %138, %137 : vector<2x96xf32>
    %140 = arith.divf %138, %139 : vector<2x96xf32>
    %141 = vector.extract_strided_slice %134 {offsets = [0, 96], sizes = [2, 32], strides = [1, 1]} : vector<2x128xf32> to vector<2x32xf32>
    %142 = math.tanh %141 : vector<2x32xf32>
    %143 = vector.extract_strided_slice %140 {offsets = [0, 0], sizes = [2, 32], strides = [1, 1]} : vector<2x96xf32> to vector<2x32xf32>
    %144 = vector.extract_strided_slice %140 {offsets = [0, 32], sizes = [2, 32], strides = [1, 1]} : vector<2x96xf32> to vector<2x32xf32>
    %145 = vector.extract_strided_slice %140 {offsets = [0, 64], sizes = [2, 32], strides = [1, 1]} : vector<2x96xf32> to vector<2x32xf32>
    %146 = arith.mulf %144, %124 : vector<2x32xf32>
    %147 = arith.mulf %143, %142 : vector<2x32xf32>
    %148 = arith.addf %146, %147 : vector<2x32xf32>
    %149 = math.tanh %148 : vector<2x32xf32>
    %150 = arith.mulf %145, %149 : vector<2x32xf32>
    %151 = vector.shape_cast %150 : vector<2x32xf32> to vector<2x1x32xf32>
    %c0_45 = arith.constant 0 : index
    %c5_46 = arith.constant 5 : index
    %c0_47 = arith.constant 0 : index
    %152 = vector.load %arg9[%c0_45, %c5_46, %c0_47] : memref<2x8x32xf32, #tpu.memory_space<vmem>>, vector<2x1x32xf32>
    tpu.vector_store %arg9[%c0_45, %c5_46, %c0_47], %151 {strides = array<i32>} : memref<2x8x32xf32, #tpu.memory_space<vmem>>, vector<2x1x32xf32>,
    %153 = vector.shape_cast %150 : vector<2x32xf32> to vector<2x1x32xf32>
    %c0_48 = arith.constant 0 : index
    %c2_49 = arith.constant 2 : index
    %c0_50 = arith.constant 0 : index
    %154 = vector.load %arg10[%c0_48, %c2_49, %c0_50] : memref<2x8x32xf32, #tpu.memory_space<vmem>>, vector<2x1x32xf32>
    tpu.vector_store %arg10[%c0_48, %c2_49, %c0_50], %153 {strides = array<i32>} : memref<2x8x32xf32, #tpu.memory_space<vmem>>, vector<2x1x32xf32>,
    %155 = vector.extract_strided_slice %7 {offsets = [6, 0, 0], sizes = [1, 2, 128], strides = [1, 1, 1]} : vector<8x2x128xf32> to vector<1x2x128xf32>
    %156 = vector.shape_cast %155 : vector<1x2x128xf32> to vector<2x128xf32>
    %cst_51 = arith.constant dense<0.000000e+00> : vector<2x128xf32>
    %157 = tpu.matmul %150, %8, %cst_51 {dimension_numbers = #tpu.dot_dimension_numbers<[1], [0], [0], [1], [0, 0, 1, 1], [], []>} : vector<2x32xf32>, vector<32x128xf32>, vector<2x128xf32> -> vector<2x128xf32>
    %158 = arith.addf %156, %157 : vector<2x128xf32>
    %159 = vector.extract_strided_slice %158 {offsets = [0, 0], sizes = [2, 96], strides = [1, 1]} : vector<2x128xf32> to vector<2x96xf32>
    %160 = arith.negf %159 : vector<2x96xf32>
    %161 = math.exp %160 : vector<2x96xf32>
    %cst_52 = arith.constant 1.000000e+00 : f32
    %162 = vector.broadcast %cst_52 : f32 to vector<2x96xf32>
    %163 = arith.addf %162, %161 : vector<2x96xf32>
    %164 = arith.divf %162, %163 : vector<2x96xf32>
    %165 = vector.extract_strided_slice %158 {offsets = [0, 96], sizes = [2, 32], strides = [1, 1]} : vector<2x128xf32> to vector<2x32xf32>
    %166 = math.tanh %165 : vector<2x32xf32>
    %167 = vector.extract_strided_slice %164 {offsets = [0, 0], sizes = [2, 32], strides = [1, 1]} : vector<2x96xf32> to vector<2x32xf32>
    %168 = vector.extract_strided_slice %164 {offsets = [0, 32], sizes = [2, 32], strides = [1, 1]} : vector<2x96xf32> to vector<2x32xf32>
    %169 = vector.extract_strided_slice %164 {offsets = [0, 64], sizes = [2, 32], strides = [1, 1]} : vector<2x96xf32> to vector<2x32xf32>
    %170 = arith.mulf %168, %148 : vector<2x32xf32>
    %171 = arith.mulf %167, %166 : vector<2x32xf32>
    %172 = arith.addf %170, %171 : vector<2x32xf32>
    %173 = math.tanh %172 : vector<2x32xf32>
    %174 = arith.mulf %169, %173 : vector<2x32xf32>
    %175 = vector.shape_cast %174 : vector<2x32xf32> to vector<2x1x32xf32>
    %c0_53 = arith.constant 0 : index
    %c6_54 = arith.constant 6 : index
    %c0_55 = arith.constant 0 : index
    %176 = vector.load %arg9[%c0_53, %c6_54, %c0_55] : memref<2x8x32xf32, #tpu.memory_space<vmem>>, vector<2x1x32xf32>
    tpu.vector_store %arg9[%c0_53, %c6_54, %c0_55], %175 {strides = array<i32>} : memref<2x8x32xf32, #tpu.memory_space<vmem>>, vector<2x1x32xf32>,
    %177 = vector.shape_cast %174 : vector<2x32xf32> to vector<2x1x32xf32>
    %c0_56 = arith.constant 0 : index
    %c1_57 = arith.constant 1 : index
    %c0_58 = arith.constant 0 : index
    %178 = vector.load %arg10[%c0_56, %c1_57, %c0_58] : memref<2x8x32xf32, #tpu.memory_space<vmem>>, vector<2x1x32xf32>
    tpu.vector_store %arg10[%c0_56, %c1_57, %c0_58], %177 {strides = array<i32>} : memref<2x8x32xf32, #tpu.memory_space<vmem>>, vector<2x1x32xf32>,
    %179 = vector.extract_strided_slice %7 {offsets = [7, 0, 0], sizes = [1, 2, 128], strides = [1, 1, 1]} : vector<8x2x128xf32> to vector<1x2x128xf32>
    %180 = vector.shape_cast %179 : vector<1x2x128xf32> to vector<2x128xf32>
    %cst_59 = arith.constant dense<0.000000e+00> : vector<2x128xf32>
    %181 = tpu.matmul %174, %8, %cst_59 {dimension_numbers = #tpu.dot_dimension_numbers<[1], [0], [0], [1], [0, 0, 1, 1], [], []>} : vector<2x32xf32>, vector<32x128xf32>, vector<2x128xf32> -> vector<2x128xf32>
    %182 = arith.addf %180, %181 : vector<2x128xf32>
    %183 = vector.extract_strided_slice %182 {offsets = [0, 0], sizes = [2, 96], strides = [1, 1]} : vector<2x128xf32> to vector<2x96xf32>
    %184 = arith.negf %183 : vector<2x96xf32>
    %185 = math.exp %184 : vector<2x96xf32>
    %cst_60 = arith.constant 1.000000e+00 : f32
    %186 = vector.broadcast %cst_60 : f32 to vector<2x96xf32>
    %187 = arith.addf %186, %185 : vector<2x96xf32>
    %188 = arith.divf %186, %187 : vector<2x96xf32>
    %189 = vector.extract_strided_slice %182 {offsets = [0, 96], sizes = [2, 32], strides = [1, 1]} : vector<2x128xf32> to vector<2x32xf32>
    %190 = math.tanh %189 : vector<2x32xf32>
    %191 = vector.extract_strided_slice %188 {offsets = [0, 0], sizes = [2, 32], strides = [1, 1]} : vector<2x96xf32> to vector<2x32xf32>
    %192 = vector.extract_strided_slice %188 {offsets = [0, 32], sizes = [2, 32], strides = [1, 1]} : vector<2x96xf32> to vector<2x32xf32>
    %193 = vector.extract_strided_slice %188 {offsets = [0, 64], sizes = [2, 32], strides = [1, 1]} : vector<2x96xf32> to vector<2x32xf32>
    %194 = arith.mulf %192, %172 : vector<2x32xf32>
    %195 = arith.mulf %191, %190 : vector<2x32xf32>
    %196 = arith.addf %194, %195 : vector<2x32xf32>
    %197 = math.tanh %196 : vector<2x32xf32>
    %198 = arith.mulf %193, %197 : vector<2x32xf32>
    %199 = vector.shape_cast %198 : vector<2x32xf32> to vector<2x1x32xf32>
    %c0_61 = arith.constant 0 : index
    %c7_62 = arith.constant 7 : index
    %c0_63 = arith.constant 0 : index
    %200 = vector.load %arg9[%c0_61, %c7_62, %c0_63] : memref<2x8x32xf32, #tpu.memory_space<vmem>>, vector<2x1x32xf32>
    tpu.vector_store %arg9[%c0_61, %c7_62, %c0_63], %199 {strides = array<i32>} : memref<2x8x32xf32, #tpu.memory_space<vmem>>, vector<2x1x32xf32>,
    %201 = vector.shape_cast %198 : vector<2x32xf32> to vector<2x1x32xf32>
    %c0_64 = arith.constant 0 : index
    %c0_65 = arith.constant 0 : index
    %c0_66 = arith.constant 0 : index
    %202 = vector.load %arg10[%c0_64, %c0_65, %c0_66] : memref<2x8x32xf32, #tpu.memory_space<vmem>>, vector<2x1x32xf32>
    tpu.vector_store %arg10[%c0_64, %c0_65, %c0_66], %201 {strides = array<i32>} : memref<2x8x32xf32, #tpu.memory_space<vmem>>, vector<2x1x32xf32>,
    %203 = tpu.iota {dimensions = array<i32: 2>} : vector<2x8x32xi32>
    %c16_i32 = arith.constant 16 : i32
    %204 = vector.broadcast %c16_i32 : i32 to vector<2x8x32xi32>
    %205 = arith.cmpi slt, %203, %204 : vector<2x8x32xi32>
    %c0_67 = arith.constant 0 : index
    %c0_68 = arith.constant 0 : index
    %c0_69 = arith.constant 0 : index
    %206 = vector.load %arg9[%c0_67, %c0_68, %c0_69] : memref<2x8x32xf32, #tpu.memory_space<vmem>>, vector<2x8x32xf32>
    %c0_70 = arith.constant 0 : index
    %c0_71 = arith.constant 0 : index
    %c0_72 = arith.constant 0 : index
    %207 = vector.load %arg10[%c0_70, %c0_71, %c0_72] : memref<2x8x32xf32, #tpu.memory_space<vmem>>, vector<2x8x32xf32>
    %208 = arith.select %205, %206, %207 : vector<2x8x32xi1>, vector<2x8x32xf32>
    %cst_73 = arith.constant dense<0.000000e+00> : vector<2x8xf32>
    %209 = vector.multi_reduction <add>, %208, %cst_73 [2] : vector<2x8x32xf32> to vector<2x8xf32>
    %210 = vector.shape_cast %209 : vector<2x8xf32> to vector<2x8x1xf32>
    %cst_74 = arith.constant 3.200000e+01 : f32
    %211 = vector.broadcast %cst_74 : f32 to vector<2x8x1xf32>
    %212 = arith.divf %210, %211 : vector<2x8x1xf32>
    %213 = vector.broadcast %212 : vector<2x8x1xf32> to vector<2x8x32xf32>
    %214 = arith.subf %208, %213 : vector<2x8x32xf32>
    %215 = arith.mulf %214, %214 : vector<2x8x32xf32>
    %cst_75 = arith.constant dense<0.000000e+00> : vector<2x8xf32>
    %216 = vector.multi_reduction <add>, %215, %cst_75 [2] : vector<2x8x32xf32> to vector<2x8xf32>
    %217 = vector.shape_cast %216 : vector<2x8xf32> to vector<2x8x1xf32>
    %cst_76 = arith.constant 3.200000e+01 : f32
    %218 = vector.broadcast %cst_76 : f32 to vector<2x8x1xf32>
    %219 = arith.divf %217, %218 : vector<2x8x1xf32>
    %220 = vector.broadcast %212 : vector<2x8x1xf32> to vector<2x8x32xf32>
    %221 = arith.subf %208, %220 : vector<2x8x32xf32>
    %cst_77 = arith.constant 9.99999974E-6 : f32
    %222 = vector.broadcast %cst_77 : f32 to vector<2x8x1xf32>
    %223 = arith.addf %219, %222 : vector<2x8x1xf32>
    %224 = math.rsqrt %223 : vector<2x8x1xf32>
    %225 = vector.broadcast %224 : vector<2x8x1xf32> to vector<2x8x32xf32>
    %226 = arith.mulf %221, %225 : vector<2x8x32xf32>
    %c0_78 = arith.constant 0 : index
    %c0_79 = arith.constant 0 : index
    %227 = vector.load %arg4[%c0_78, %c0_79] : memref<1x32xf32, #tpu.memory_space<vmem>>, vector<1x32xf32>
    %228 = vector.shape_cast %227 : vector<1x32xf32> to vector<1x1x32xf32>
    %229 = vector.broadcast %228 : vector<1x1x32xf32> to vector<2x8x32xf32>
    %230 = arith.mulf %226, %229 : vector<2x8x32xf32>
    %c0_80 = arith.constant 0 : index
    %c0_81 = arith.constant 0 : index
    %231 = vector.load %arg5[%c0_80, %c0_81] : memref<1x32xf32, #tpu.memory_space<vmem>>, vector<1x32xf32>
    %232 = vector.shape_cast %231 : vector<1x32xf32> to vector<1x1x32xf32>
    %233 = vector.broadcast %232 : vector<1x1x32xf32> to vector<2x8x32xf32>
    %234 = arith.addf %230, %233 : vector<2x8x32xf32>
    "tpu.trace_start"() <{level = 10 : i32, message = "bqu,bku->bqk"}> : () -> ()
    %cst_82 = arith.constant dense<0.000000e+00> : vector<2x8x8xf32>
    %235 = tpu.matmul %234, %234, %cst_82 {dimension_numbers = #tpu.dot_dimension_numbers<[2], [2], [1], [1], [0, 0, 0, 1, 1, 1], [0], [0]>} : vector<2x8x32xf32>, vector<2x8x32xf32>, vector<2x8x8xf32> -> vector<2x8x8xf32>
    "tpu.trace_stop"() : () -> ()
    %cst_83 = arith.constant 5.65685415 : f32
    %236 = vector.broadcast %cst_83 : f32 to vector<2x8x8xf32>
    %237 = arith.divf %235, %236 : vector<2x8x8xf32>
    %cst_84 = arith.constant dense<0xFF800000> : vector<2x8xf32>
    %238 = vector.multi_reduction <maximumf>, %237, %cst_84 [2] : vector<2x8x8xf32> to vector<2x8xf32>
    %239 = vector.shape_cast %238 : vector<2x8xf32> to vector<2x8x1xf32>
    %240 = vector.broadcast %239 : vector<2x8x1xf32> to vector<2x8x8xf32>
    %241 = arith.subf %237, %240 : vector<2x8x8xf32>
    %242 = math.exp %241 : vector<2x8x8xf32>
    %cst_85 = arith.constant dense<0.000000e+00> : vector<2x8xf32>
    %243 = vector.multi_reduction <add>, %242, %cst_85 [2] : vector<2x8x8xf32> to vector<2x8xf32>
    %244 = vector.shape_cast %243 : vector<2x8xf32> to vector<2x8x1xf32>
    %245 = vector.broadcast %244 : vector<2x8x1xf32> to vector<2x8x8xf32>
    %246 = arith.divf %242, %245 : vector<2x8x8xf32>
    %cst_86 = arith.constant dense<0.000000e+00> : vector<2x8xf32>
    %247 = vector.multi_reduction <add>, %246, %cst_86 [1] : vector<2x8x8xf32> to vector<2x8xf32>
    %248 = vector.shape_cast %247 : vector<2x8xf32> to vector<2x8x1xf32>
    %249 = vector.broadcast %248 : vector<2x8x1xf32> to vector<2x8x32xf32>
    %250 = arith.mulf %249, %234 : vector<2x8x32xf32>
    %cst_87 = arith.constant dense<0.000000e+00> : vector<2x32xf32>
    %251 = vector.multi_reduction <add>, %250, %cst_87 [1] : vector<2x8x32xf32> to vector<2x32xf32>
    %c0_88 = arith.constant 0 : index
    %c0_89 = arith.constant 0 : index
    %252 = vector.load %arg6[%c0_88, %c0_89] : memref<32x4xf32, #tpu.memory_space<vmem>>, vector<32x4xf32>
    %cst_90 = arith.constant dense<0.000000e+00> : vector<2x4xf32>
    %253 = tpu.matmul %251, %252, %cst_90 {dimension_numbers = #tpu.dot_dimension_numbers<[1], [0], [0], [1], [0, 0, 1, 1], [], []>} : vector<2x32xf32>, vector<32x4xf32>, vector<2x4xf32> -> vector<2x4xf32>
    %c0_91 = arith.constant 0 : index
    %c0_92 = arith.constant 0 : index
    %254 = vector.load %arg7[%c0_91, %c0_92] : memref<1x4xf32, #tpu.memory_space<vmem>>, vector<1x4xf32>
    %255 = vector.broadcast %254 : vector<1x4xf32> to vector<2x4xf32>
    %256 = arith.addf %253, %255 : vector<2x4xf32>
    %cst_93 = arith.constant dense<0xFF800000> : vector<2xf32>
    %257 = vector.multi_reduction <maximumf>, %256, %cst_93 [1] : vector<2x4xf32> to vector<2xf32>
    %258 = vector.shape_cast %257 : vector<2xf32> to vector<2x1xf32>
    %259 = vector.broadcast %258 : vector<2x1xf32> to vector<2x4xf32>
    %260 = arith.subf %256, %259 : vector<2x4xf32>
    %261 = math.exp %260 : vector<2x4xf32>
    %cst_94 = arith.constant dense<0.000000e+00> : vector<2xf32>
    %262 = vector.multi_reduction <add>, %261, %cst_94 [1] : vector<2x4xf32> to vector<2xf32>
    %263 = vector.shape_cast %262 : vector<2xf32> to vector<2x1xf32>
    %264 = math.log %263 : vector<2x1xf32>
    %265 = arith.addf %264, %258 : vector<2x1xf32>
    %266 = vector.broadcast %265 : vector<2x1xf32> to vector<2x4xf32>
    %267 = arith.subf %256, %266 : vector<2x4xf32>
    %c0_95 = arith.constant 0 : index
    %c0_96 = arith.constant 0 : index
    %268 = vector.load %arg8[%c0_95, %c0_96] : memref<2x4xf32, #tpu.memory_space<vmem>>, vector<2x4xf32>
    tpu.vector_store %arg8[%c0_95, %c0_96], %267 {strides = array<i32>} : memref<2x4xf32, #tpu.memory_space<vmem>>, vector<2x4xf32>,
    return
  }
}

</mosaic_0001>

<bundles_post_ra>
// kernel: tpu_custom_call.1
= control target key start
LH: loop header
LB: loop body
LE: loop exit
PB: predicated region body
PF: predicated region fallthrough
CT: control target
= control target key end

     0   :  { %13 = vsyncpa [#allocation5], 0  ;;  %s2516_s0 = inlined_call_operand.hbm [shape: f32[8,2,32], index: 0, kind: input, shape index: {}]   ;;  %s2517_s1 = inlined_call_operand.vmem [shape: f32[32,128], index: 1, kind: input, shape index: {}]   ;;  %s2518_s2 = inlined_call_operand.hbm [shape: f32[32,128], index: 2, kind: input, shape index: {}]   ;;  %s2519_s3 = inlined_call_operand.vmem [shape: f32[1,128], index: 3, kind: input, shape index: {}]   ;;  %s2520_s4 = inlined_call_operand.vmem [shape: f32[1,32], index: 4, kind: input, shape index: {}]   ;;  %s2521_s5 = inlined_call_operand.vmem [shape: f32[1,32], index: 5, kind: input, shape index: {}]   ;;  %s2522_s6 = inlined_call_operand.vmem [shape: f32[32,4], index: 6, kind: input, shape index: {}]   ;;  %s2523_s7 = inlined_call_operand.vmem [shape: f32[1,4], index: 7, kind: input, shape index: {}]   ;;  %s2524_s8 = inlined_call_operand.hbm [shape: f32[2,4], index: 8, kind: output, shape index: {}]  }
   0x1   :  { %14 = vsyncpa [#allocation8], 0 }
   0x2   :  { %15 = vsyncpa [#allocation6], 0  ;;  %s2112_s27 = smov [#allocation4]   ;;  %s2040_s9 = scalar_lea.hbm %s2516_s0, 256 }
   0x3   :  { %s21_s28 = sshll.u32 %s2112_s27, 4  ;;  %p2041_p0 = scmp.ne.s32.totalorder %s2516_s0, %s2040_s9  ;;  %s22_s28 = int_to_ptr.vmem [resolvable:$true] %s21_s28 }
   0x4   :  { %p2044_p1 = scmp.lt.u32.totalorder %s2040_s9, %s2516_s0 }
   0x6   :  { %p2046_p2 = pnand %p2044_p1, %p2041_p0 }
   0x8   :  { %2049 = shalt.err (!%p2046_p2)
}
   0x9   :  { %s2050_s14 = scalar_lea.vmem %s22_s28, 256  ;;  %p2055_p4 = scmp.lt.s32.totalorder %s22_s28, %s22_s28 }
   0xa   :  { %p2051_p3 = scmp.ne.s32.totalorder %s22_s28, %s2050_s14  ;;  %p2056_p5 = scmp.lt.s32.totalorder %s2050_s14, %s2050_s14 }
   0xc   :  { %p2057_p6 = por %p2056_p5, %p2055_p4 }
   0xe   :  { %p2058_p7 = pnand %p2057_p6, %p2051_p3 }
  0x10   :  { %2061 = shalt.err (!%p2058_p7)
}
  0x11   :  { %s2113_s15 = smov 32   ;;  %s2114_s16 = smov 2  }
  0x12   :  { %27 = dma.hbm_to_vmem [thread:$0]  %s2516_s0, 256, %s22_s28, [#allocation5], %s2113_s15, %s2113_s15, %s2114_s16  }
  0x13   :  { %s2115_s19 = smov [#allocation7]   ;;  %s2062_s23 = scalar_lea.hbm %s2518_s2, 512 }
  0x14   :  { %s35_s20 = sshll.u32 %s2115_s19, 4  ;;  %p2063_p8 = scmp.ne.s32.totalorder %s2518_s2, %s2062_s23  ;;  %s36_s20 = int_to_ptr.vmem [resolvable:$true] %s35_s20 }
  0x15   :  { %p2066_p9 = scmp.lt.u32.totalorder %s2062_s23, %s2518_s2 }
  0x17   :  { %p2068_p10 = pnand %p2066_p9, %p2063_p8 }
  0x19   :  { %2071 = shalt.err (!%p2068_p10)
}
  0x1a   :  { %s2072_s29 = scalar_lea.vmem %s36_s20, 512  ;;  %p2077_p12 = scmp.lt.s32.totalorder %s36_s20, %s36_s20 }
  0x1b   :  { %p2073_p11 = scmp.ne.s32.totalorder %s36_s20, %s2072_s29  ;;  %p2078_p13 = scmp.lt.s32.totalorder %s2072_s29, %s2072_s29 }
  0x1d   :  { %p2079_p0 = por %p2078_p13, %p2077_p12 }
  0x1f   :  { %p2080_p1 = pnand %p2079_p0, %p2073_p11 }
  0x21   :  { %2083 = shalt.err (!%p2080_p1)
}
  0x22   :  { %s2116_s0 = smov 128   ;;  %s2117_s28 = smov 8  }
  0x23   :  { %41 = dma.hbm_to_vmem [thread:$0]  %s2518_s2, 512, %s36_s20, [#allocation8], %s2116_s0, %s2116_s0, %s2117_s28  }
  0x24   :  { %2106 = dma.done.wait [#allocation5], 256  }
  0x25   :  { %2107 = vsyncadd [#allocation5], 4294967040 }
  0x26   :  { %2108 = dma.done.wait [#allocation8], 512  }
  0x27   :  { %2109 = vsyncadd [#allocation8], 4294966784  ;;  %v90_v0 = vlaneseq  ;;  %v2118_v1 = vmov 0.0|0.0   ;;  %v2119_v2 = vmov 1983009808   ;;  %vm2120_vm0 = vmmov 0  }
  0x28   :  { %1893 = vmatprep.subr.bf16.mxu1 %v2118_v1  ;;  %v88_v3 = vunpack.c.l.s4 %v2119_v2  ;;  %v2121_v4 = vmov 0.0   ;;  %v66_v7 = vld [vmem:[%s2517_s1] sm:$0xff]  ;;  %v67_v8 = vld [vmem:[%s2517_s1 + $0x8] sm:$0xff]  ;;  %v68_v9 = vld [vmem:[%s2517_s1 + $0x10] sm:$0xff]  ;;  %vm119_vm1 = vcmask 261120   ;;  %vm368_vm2 = vcmask 253952  }
  0x29   :  { %1784 = vmatprep.mubr.msk.f32.mxu1 %vm2120_vm0, %v2121_v4  ;;  %v2200_v6 = vshrl.u32 %v90_v0, 7  ;;  %v1885_v10 = vpack.c.bf16 %v67_v8, %v66_v7  ;;  %v69_v11 = vld [vmem:[%s2517_s1 + $0x18] sm:$0xff]  ;;  %v243_v12 = vld [vmem:[#allocation7] sm:$0xff]  ;;  %v58_v17 = vld [vmem:[#allocation4] sm:$0x3]  ;;  %vm1507_vm4 = vcmask 64512  }
  0x2a   :  { %v89_v5 = vunpack.c.0.s8 %v88_v3  ;;  %v244_v13 = vld [vmem:[#allocation7 + $0x8] sm:$0xff]  ;;  %v1889_v15 = vpack.c.bf16 %v69_v11, %v68_v9  ;;  %v59_v18 = vld [vmem:[#allocation4 + $0x2] sm:$0x3]  ;;  %v60_v19 = vld [vmem:[#allocation4 + $0x4] sm:$0x3]  ;;  %vm1579_vm5 = vcmask 1041409  }
  0x2b   :  { %v2217_v16 = vpack.c.bf16 %v244_v13, %v243_v12  ;;  %1886 = vmatprep.subr.bf16.mxu0 %v1885_v10  ;;  %v61_v20 = vld [vmem:[#allocation4 + $0x6] sm:$0x3]  ;;  %v85_v21 = vcombine.low %v58_v17, %v59_v18  ;;  %v62_v22 = vld [vmem:[#allocation4 + $0x8] sm:$0x3]  ;;  %v63_v23 = vld [vmem:[#allocation4 + $0xa] sm:$0x3] }
  0x2c   :  { %v2215_v14 = vsub.s32 %v89_v5, %v2200_v6  ;;  %1888 = vmatpush3.bf16.msra.mxu0 %v1885_v10  ;;  %v86_v24 = vcombine.low %v60_v19, %v61_v20  ;;  %v64_v25 = vld [vmem:[#allocation4 + $0xc] sm:$0x3]  ;;  %v65_v26 = vld [vmem:[#allocation4 + $0xe] sm:$0x3]  ;;  %v102_v27 = vcombine.low %v62_v22, %v63_v23  ;;  %v245_v28 = vld [vmem:[#allocation7 + $0x10] sm:$0xff]  ;;  %vm1653_vm6 = vcmask 25600  }
  0x2d   :  { %1895 = vmatpush3.bf16.msra.mxu1 %v2217_v16  ;;  %1890 = vmatprep.subr.bf16.mxu0 %v1889_v15  ;;  %v103_v30 = vcombine.low %v64_v25, %v65_v26  ;;  %v246_v31 = vld [vmem:[#allocation7 + $0x18] sm:$0xff]  ;;  %v1684_v38 = vld [vmem:[%s2519_s3] ss:$0 sm:$0xff]  ;;  %s2122_s3 = smov 64  }
  0x2e   :  { %v93_v29 = vrot.slane %v85_v21, %v2215_v14  ;;  %1896 = vmatprep.subr.bf16.mxu1 %v2118_v1  ;;  %v100_v32 = vrot.slane %v86_v24, %v2215_v14  ;;  %v110_v33 = vrot.slane %v102_v27, %v2215_v14  ;;  %v2224_v34 = vpack.c.bf16 %v246_v31, %v245_v28 }
  0x2f   :  { %v117_v35 = vrot.slane %v103_v30, %v2215_v14 }
  0x30   :  { %1892 = vmatpush3.bf16.msra.mxu0 %v1889_v15  ;;  %v101_v36 = vcombine.low %v93_v29, %v100_v32 }
  0x31   :  { %1898 = vmatpush3.bf16.msra.mxu1 %v2224_v34  ;;  %v118_v37 = vcombine.low %v110_v33, %v117_v35  ;;  %1899 = vmatprep.subr.bf16.mxu0 %v2118_v1 }
  0x32   :  { %1905 = vmatprep.subr.bf16.mxu1 %v2118_v1  ;;  %1773 = vmatprep.mubr.msk.f32.mxu0 %vm119_vm1, %v101_v36 }
  0x33   :  { %1774 = vmatmul.mubr.msk.f32.vlgmr.msra.gmra.mrb[0].mxu0 %vm119_vm1, %v118_v37 }
  0x34   :  { %1785 = vmatmul.mubr.f32.vlgmr.msra.gmra.mrb[0].mxu1 %v2121_v4  ;;  %1901 = vmatpush3.bf16.msra.mxu0 %v2217_v16 }
  0x35   :  { %1795 = vmatprep.mubr.msk.f32.mxu0 %vm2120_vm0, %v2121_v4  ;;  %1902 = vmatprep.subr.bf16.mxu0 %v2118_v1 }
  0x36   :  { %1907 = vmatpush3.bf16.msra.mxu1 %v2217_v16  ;;  %1806 = vmatprep.mubr.msk.f32.mxu1 %vm2120_vm0, %v2121_v4 }
  0x37   :  { %1908 = vmatprep.subr.bf16.mxu1 %v2118_v1 }
  0x38   :  { %1904 = vmatpush3.bf16.msra.mxu0 %v2224_v34 }
  0x39   :  { %1911 = vmatprep.subr.bf16.mxu0 %v2118_v1 }
  0x3a   :  { %1910 = vmatpush3.bf16.msra.mxu1 %v2224_v34 }
  0x3b   :  { %1917 = vmatprep.subr.bf16.mxu1 %v2118_v1 }
 0x106   :  { %v1775_v39 = vpop.f32.mrb[0].mxu0 }
 0x107   :  { %v316_v40 = vpop.f32.mrb[0].mxu1  ;;  %v2248_v41 = vadd.f32 %v1775_v39, %v1684_v38  ;;  %v190_v42 = vpop.f32.mrb[1].mxu0 }
 0x108   :  { %v1786_v43 = vpop.f32.mrb[1].mxu1  ;;  %v2250_v44 = vadd.f32 %v1684_v38, %v190_v42 }
 0x10a   :  { %v208_v45 = vrot.slane %v2250_v44, %v2215_v14  ;;  %v201_v23 = vcombine.high %v2250_v44, %v2250_v44 }
 0x10c   :  { %v320_v46 = vadd.f32 %v316_v40, %v208_v45  ;;  %v216_v62 = vcombine.high %v208_v45, %v208_v45  ;;  %v215_v24 = vrot.slane %v201_v23, %v2215_v14 }
 0x10e   :  { %1960 = vtanh.f32 %v320_v46  ;;  %v1687_v48 = vmul.f32 -1.442695, %v320_v46  ;;  %v217_v45 = vcombine.high %v215_v24, %v215_v24 }
 0x110   :  { %1962 = vpow2.f32 %v1687_v48 }
 0x118   :  { %v1961_v47 = vpop.eup %1960 }
 0x119   :  { %330 = vrot.lane.b32.xlu0 %v1961_v47, %s2113_s15 }
 0x11a   :  { %v1963_v49 = vpop.eup %1962 }
 0x11b   :  { %v324_v50 = vadd.f32 1.0, %v1963_v49 }
 0x11d   :  { %1964 = vrcp.f32 %v324_v50 }
 0x127   :  { %v1965_v51 = vpop.eup %1964 }
 0x128   :  { %v328_v54 = vmul.f32 0.0, %v1965_v51 }
 0x18b   :  { %v331_v52 = vpop.permute.xlu0 %330 }
 0x18c   :  { %v333_v53 = vmul.f32 %v1965_v51, %v331_v52 }
 0x18e   :  { %335 = vrot.lane.b32.xlu0 %v333_v53, %s2113_s15 }
 0x200   :  { %v336_v55 = vpop.permute.xlu0 %335 }
 0x201   :  { %v338_v56 = vadd.f32 %v336_v55, %v328_v54 }
 0x203   :  { %1966 = vtanh.f32 %v338_v56 }
 0x20d   :  { %v1967_v57 = vpop.eup %1966 }
 0x20e   :  { %341 = vrot.lane.b32.xlu1 %v1967_v57, %s2113_s15 }
 0x280   :  { %v342_v58 = vpop.permute.xlu1 %341 }
 0x281   :  { %v2257_v59 = vmul.f32 %v1965_v51, %v342_v58 }
 0x283   :  { %v379_v60 = vrot.slane %v2257_v59, %v2215_v14 }
 0x285   :  { %380 = vrot.lane.b32.xlu1 %v379_v60, %s2122_s3 }
 0x2f7   :  { %v381_v61 = vpop.permute.xlu1 %380 }
 0x2f8   :  { %1796 = vmatmul.mubr.msk.f32.vlgmr.msra.gmra.mrb[2].mxu0 %vm119_vm1, %v381_v61 }
 0x2f9   :  { %1913 = vmatpush3.bf16.msra.mxu0 %v2217_v16  ;;  %1817 = vmatprep.mubr.msk.f32.mxu0 %vm2120_vm0, %v2121_v4 }
 0x2fa   :  { %1914 = vmatprep.subr.bf16.mxu0 %v2118_v1 }
 0x2fd   :  { %1916 = vmatpush3.bf16.msra.mxu0 %v2224_v34 }
 0x2fe   :  { %1923 = vmatprep.subr.bf16.mxu0 %v2118_v1 }
 0x3cb   :  { %v450_v63 = vpop.f32.mrb[2].mxu0 }
 0x3cc   :  { %v454_v2 = vadd.f32 %v450_v63, %v216_v62  ;;  %v1797_v3 = vpop.f32.mrb[3].mxu0 }
 0x3cd   :  { %v225_v3 = vrot.slane %v2248_v41, %v2215_v14 }
 0x3ce   :  { %1968 = vtanh.f32 %v454_v2  ;;  %v1689_v7 = vmul.f32 -1.442695, %v454_v2 }
 0x3d0   :  { %1970 = vpow2.f32 %v1689_v7 }
 0x3d8   :  { %v1969_v5 = vpop.eup %1968 }
 0x3d9   :  { %464 = vrot.lane.b32.xlu0 %v1969_v5, %s2113_s15 }
 0x3da   :  { %v1971_v8 = vpop.eup %1970 }
 0x3db   :  { %v458_v9 = vadd.f32 1.0, %v1971_v8 }
 0x3dd   :  { %1972 = vrcp.f32 %v458_v9 }
 0x3e7   :  { %v1973_v10 = vpop.eup %1972 }
 0x3e8   :  { %v462_v13 = vmul.f32 %v1973_v10, %v338_v56 }
 0x44b   :  { %v465_v11 = vpop.permute.xlu0 %464 }
 0x44c   :  { %v467_v12 = vmul.f32 %v1973_v10, %v465_v11 }
 0x44e   :  { %469 = vrot.lane.b32.xlu1 %v467_v12, %s2113_s15 }
 0x4c0   :  { %v470_v15 = vpop.permute.xlu1 %469 }
 0x4c1   :  { %v472_v17 = vadd.f32 %v470_v15, %v462_v13 }
 0x4c3   :  { %1974 = vtanh.f32 %v472_v17 }
 0x4cd   :  { %v1975_v18 = vpop.eup %1974 }
 0x4ce   :  { %475 = vrot.lane.b32.xlu0 %v1975_v18, %s2113_s15 }
 0x540   :  { %v476_v19 = vpop.permute.xlu0 %475 }
 0x541   :  { %v2272_v20 = vmul.f32 %v1973_v10, %v476_v19 }
 0x543   :  { %v512_v21 = vrot.slane %v2272_v20, %v2215_v14 }
 0x545   :  { %513 = vrot.lane.b32.xlu1 %v512_v21, %s2122_s3 }
 0x5b7   :  { %v514_v22 = vpop.permute.xlu1 %513 }
 0x5b8   :  { %1807 = vmatmul.mubr.msk.f32.vlgmr.msra.gmra.mrb[2].mxu1 %vm119_vm1, %v514_v22 }
 0x5b9   :  { %1919 = vmatpush3.bf16.msra.mxu1 %v2217_v16  ;;  %1828 = vmatprep.mubr.msk.f32.mxu1 %vm2120_vm0, %v2121_v4 }
 0x5ba   :  { %1920 = vmatprep.subr.bf16.mxu1 %v2118_v1 }
 0x5bd   :  { %1922 = vmatpush3.bf16.msra.mxu1 %v2224_v34 }
 0x5be   :  { %1929 = vmatprep.subr.bf16.mxu1 %v2118_v1 }
 0x68b   :  { %v583_v25 = vpop.f32.mrb[2].mxu1 }
 0x68c   :  { %v587_v26 = vadd.f32 %v583_v25, %v215_v24  ;;  %v1808_v27 = vpop.f32.mrb[3].mxu1 }
 0x68d   :  { %v233_v27 = vcombine.high %v225_v3, %v225_v3 }
 0x68e   :  { %1976 = vtanh.f32 %v587_v26  ;;  %v1691_v29 = vmul.f32 -1.442695, %v587_v26 }
 0x690   :  { %1978 = vpow2.f32 %v1691_v29 }
 0x698   :  { %v1977_v28 = vpop.eup %1976 }
 0x699   :  { %597 = vrot.lane.b32.xlu0 %v1977_v28, %s2113_s15 }
 0x69a   :  { %v1979_v30 = vpop.eup %1978 }
 0x69b   :  { %v591_v31 = vadd.f32 1.0, %v1979_v30 }
 0x69d   :  { %1980 = vrcp.f32 %v591_v31 }
 0x6a7   :  { %v1981_v32 = vpop.eup %1980 }
 0x6a8   :  { %v595_v36 = vmul.f32 %v1981_v32, %v472_v17 }
 0x70b   :  { %v598_v33 = vpop.permute.xlu0 %597 }
 0x70c   :  { %v600_v35 = vmul.f32 %v1981_v32, %v598_v33 }
 0x70e   :  { %602 = vrot.lane.b32.xlu1 %v600_v35, %s2113_s15 }
 0x780   :  { %v603_v37 = vpop.permute.xlu1 %602 }
 0x781   :  { %v605_v38 = vadd.f32 %v603_v37, %v595_v36 }
 0x783   :  { %1982 = vtanh.f32 %v605_v38 }
 0x78d   :  { %v1983_v39 = vpop.eup %1982 }
 0x78e   :  { %608 = vrot.lane.b32.xlu0 %v1983_v39, %s2113_s15 }
 0x800   :  { %v609_v40 = vpop.permute.xlu0 %608 }
 0x801   :  { %v2290_v42 = vmul.f32 %v1981_v32, %v609_v40 }
 0x803   :  { %v645_v43 = vrot.slane %v2290_v42, %v2215_v14 }
 0x805   :  { %646 = vrot.lane.b32.xlu1 %v645_v43, %s2122_s3 }
 0x877   :  { %v647_v44 = vpop.permute.xlu1 %646 }
 0x878   :  { %1818 = vmatmul.mubr.msk.f32.vlgmr.msra.gmra.mrb[4].mxu0 %vm119_vm1, %v647_v44 }
 0x879   :  { %1925 = vmatpush3.bf16.msra.mxu0 %v2217_v16  ;;  %1839 = vmatprep.mubr.msk.f32.mxu0 %vm2120_vm0, %v2121_v4 }
 0x87a   :  { %1926 = vmatprep.subr.bf16.mxu0 %v2118_v1 }
 0x87d   :  { %1928 = vmatpush3.bf16.msra.mxu0 %v2224_v34 }
 0x87e   :  { %1935 = vmatprep.subr.bf16.mxu0 %v2118_v1 }
 0x94b   :  { %v716_v46 = vpop.f32.mrb[4].mxu0 }
 0x94c   :  { %v720_v47 = vadd.f32 %v716_v46, %v217_v45  ;;  %v1819_v48 = vpop.f32.mrb[5].mxu0 }
 0x94e   :  { %1984 = vtanh.f32 %v720_v47  ;;  %v1693_v50 = vmul.f32 -1.442695, %v720_v47  ;;  %v218_v47 = vcombine.high %v2248_v41, %v2248_v41 }
 0x950   :  { %1986 = vpow2.f32 %v1693_v50  ;;  %v232_v48 = vrot.slane %v218_v47, %v2215_v14 }
 0x958   :  { %v1985_v49 = vpop.eup %1984 }
 0x959   :  { %730 = vrot.lane.b32.xlu0 %v1985_v49, %s2113_s15 }
 0x95a   :  { %v1987_v51 = vpop.eup %1986 }
 0x95b   :  { %v724_v52 = vadd.f32 1.0, %v1987_v51 }
 0x95d   :  { %1988 = vrcp.f32 %v724_v52 }
 0x967   :  { %v1989_v53 = vpop.eup %1988 }
 0x968   :  { %v728_v56 = vmul.f32 %v1989_v53, %v605_v38 }
 0x9cb   :  { %v731_v54 = vpop.permute.xlu0 %730 }
 0x9cc   :  { %v733_v55 = vmul.f32 %v1989_v53, %v731_v54 }
 0x9ce   :  { %735 = vrot.lane.b32.xlu1 %v733_v55, %s2113_s15 }
 0xa40   :  { %v736_v57 = vpop.permute.xlu1 %735 }
 0xa41   :  { %v738_v58 = vadd.f32 %v736_v57, %v728_v56 }
 0xa43   :  { %1990 = vtanh.f32 %v738_v58 }
 0xa4d   :  { %v1991_v60 = vpop.eup %1990 }
 0xa4e   :  { %741 = vrot.lane.b32.xlu0 %v1991_v60, %s2113_s15 }
 0xac0   :  { %v742_v61 = vpop.permute.xlu0 %741 }
 0xac1   :  { %v2305_v62 = vmul.f32 %v1989_v53, %v742_v61 }
 0xac3   :  { %v778_v63 = vrot.slane %v2305_v62, %v2215_v14 }
 0xac5   :  { %779 = vrot.lane.b32.xlu1 %v778_v63, %s2122_s3 }
 0xb37   :  { %v780_v2 = vpop.permute.xlu1 %779 }
 0xb38   :  { %1829 = vmatmul.mubr.msk.f32.vlgmr.msra.gmra.mrb[4].mxu1 %vm119_vm1, %v780_v2 }
 0xb39   :  { %1931 = vmatpush3.bf16.msra.mxu1 %v2217_v16  ;;  %1850 = vmatprep.mubr.msk.f32.mxu1 %vm2120_vm0, %v2121_v4 }
 0xb3a   :  { %1932 = vmatprep.subr.bf16.mxu1 %v2118_v1 }
 0xb3d   :  { %1934 = vmatpush3.bf16.msra.mxu1 %v2224_v34 }
 0xb3e   :  { %1864 = vmatprep.subr.mxu1 %v2121_v4 }
 0xc0b   :  { %v849_v5 = vpop.f32.mrb[4].mxu1 }
 0xc0c   :  { %v853_v7 = vadd.f32 %v849_v5, %v225_v3  ;;  %v1830_v8 = vpop.f32.mrb[5].mxu1 }
 0xc0d   :  { %v234_v8 = vcombine.high %v232_v48, %v232_v48 }
 0xc0e   :  { %1992 = vtanh.f32 %v853_v7  ;;  %v1695_v10 = vmul.f32 -1.442695, %v853_v7 }
 0xc10   :  { %1994 = vpow2.f32 %v1695_v10 }
 0xc18   :  { %v1993_v9 = vpop.eup %1992 }
 0xc19   :  { %863 = vrot.lane.b32.xlu0 %v1993_v9, %s2113_s15 }
 0xc1a   :  { %v1995_v11 = vpop.eup %1994 }
 0xc1b   :  { %v857_v12 = vadd.f32 1.0, %v1995_v11 }
 0xc1d   :  { %1996 = vrcp.f32 %v857_v12 }
 0xc27   :  { %v1997_v13 = vpop.eup %1996 }
 0xc28   :  { %v861_v18 = vmul.f32 %v1997_v13, %v738_v58 }
 0xc8b   :  { %v864_v15 = vpop.permute.xlu0 %863 }
 0xc8c   :  { %v866_v17 = vmul.f32 %v1997_v13, %v864_v15 }
 0xc8e   :  { %868 = vrot.lane.b32.xlu1 %v866_v17, %s2113_s15  ;;  %v2123_v17 = vmov 1966171168  }
 0xd00   :  { %v869_v19 = vpop.permute.xlu1 %868 }
 0xd01   :  { %v871_v21 = vadd.f32 %v869_v19, %v861_v18  ;;  %v347_v18 = vunpack.c.l.s4 %v2123_v17  ;;  %v1305_v17 = vand.u32 127, %v90_v0 }
 0xd03   :  { %1998 = vtanh.f32 %v871_v21  ;;  %v348_v19 = vunpack.c.0.s8 %v347_v18  ;;  %vm1306_vm3 = vcmp.lt.s32.totalorder %v1305_v17, 16 }
 0xd0d   :  { %v1999_v22 = vpop.eup %1998 }
 0xd0e   :  { %874 = vrot.lane.b32.xlu0 %v1999_v22, %s2113_s15 }
 0xd80   :  { %v875_v23 = vpop.permute.xlu0 %874 }
 0xd81   :  { %v2322_v24 = vmul.f32 %v1997_v13, %v875_v23 }
 0xd83   :  { %v911_v25 = vrot.slane %v2322_v24, %v2215_v14 }
 0xd85   :  { %912 = vrot.lane.b32.xlu1 %v911_v25, %s2122_s3  ;;  %v2363_v25 = vsub.s32 0, %v2200_v6 }
 0xdf7   :  { %v913_v26 = vpop.permute.xlu1 %912 }
 0xdf8   :  { %1840 = vmatmul.mubr.msk.f32.vlgmr.msra.gmra.mrb[6].mxu0 %vm119_vm1, %v913_v26 }
 0xdf9   :  { %1937 = vmatpush3.bf16.msra.mxu0 %v2217_v16  ;;  %1861 = vmatprep.mubr.msk.f32.mxu0 %vm2120_vm0, %v2121_v4 }
 0xdfa   :  { %1938 = vmatprep.subr.bf16.mxu0 %v2118_v1 }
 0xdfd   :  { %1940 = vmatpush3.bf16.msra.mxu0 %v2224_v34 }
 0xdfe   :  { %1941 = vmatprep.subr.bf16.mxu0 %v2118_v1 }
 0xecb   :  { %v982_v28 = vpop.f32.mrb[6].mxu0 }
 0xecc   :  { %v986_v29 = vadd.f32 %v982_v28, %v233_v27  ;;  %v1841_v30 = vpop.f32.mrb[7].mxu0 }
 0xece   :  { %2000 = vtanh.f32 %v986_v29  ;;  %v1697_v32 = vmul.f32 -1.442695, %v986_v29 }
 0xed0   :  { %2002 = vpow2.f32 %v1697_v32 }
 0xed8   :  { %v2001_v31 = vpop.eup %2000 }
 0xed9   :  { %996 = vrot.lane.b32.xlu0 %v2001_v31, %s2113_s15 }
 0xeda   :  { %v2003_v16 = vpop.eup %2002 }
 0xedb   :  { %v990_v33 = vadd.f32 1.0, %v2003_v16 }
 0xedd   :  { %2004 = vrcp.f32 %v990_v33 }
 0xee7   :  { %v2005_v35 = vpop.eup %2004 }
 0xee8   :  { %v994_v34 = vmul.f32 %v2005_v35, %v871_v21  ;;  %v2358_v21 = vsub.s32 %v348_v19, %v2200_v6 }
 0xeea   :  { %v352_v26 = vrot.slane %v2257_v59, %v2358_v21  ;;  %v619_v28 = vrot.slane %v2290_v42, %v2358_v21  ;;  %v885_v30 = vrot.slane %v2322_v24, %v2358_v21 }
 0xeec   :  { %v357_v29 = vrot.slane %v352_v26, %v2363_v25  ;;  %v624_v6 = vrot.slane %v619_v28, %v2363_v25  ;;  %v890_v31 = vrot.slane %v885_v30, %v2363_v25  ;;  %v353_v32 = vcombine.high %v352_v26, %v352_v26 }
 0xeed   :  { %v620_v16 = vcombine.high %v619_v28, %v619_v28  ;;  %v886_v24 = vcombine.high %v885_v30, %v885_v30 }
 0xeee   :  { %v361_v33 = vrot.slane %v353_v32, %v2363_v25 }
 0xf4b   :  { %v997_v36 = vpop.permute.xlu0 %996 }
 0xf4c   :  { %v999_v37 = vmul.f32 %v2005_v35, %v997_v36 }
 0xf4e   :  { %1001 = vrot.lane.b32.xlu1 %v999_v37, %s2113_s15  ;;  %v894_v37 = vrot.slane %v886_v24, %v2363_v25 }
 0xfc0   :  { %v1002_v38 = vpop.permute.xlu1 %1001 }
 0xfc1   :  { %v1004_v39 = vadd.f32 %v1002_v38, %v994_v34 }
 0xfc3   :  { %2006 = vtanh.f32 %v1004_v39 }
 0xfcd   :  { %v2007_v40 = vpop.eup %2006 }
 0xfce   :  { %1007 = vrot.lane.b32.xlu0 %v2007_v40, %s2113_s15 }
0x1040   :  { %v1008_v43 = vpop.permute.xlu0 %1007 }
0x1041   :  { %v2337_v44 = vmul.f32 %v2005_v35, %v1008_v43  ;;  %v628_v35 = vrot.slane %v620_v16, %v2363_v25 }
0x1043   :  { %v1044_v45 = vrot.slane %v2337_v44, %v2215_v14 }
0x1045   :  { %1045 = vrot.lane.b32.xlu1 %v1044_v45, %s2122_s3 }
0x10b7   :  { %v1046_v46 = vpop.permute.xlu1 %1045 }
0x10b8   :  { %1851 = vmatmul.mubr.msk.f32.vlgmr.msra.gmra.mrb[6].mxu1 %vm119_vm1, %v1046_v46  ;;  %v486_v46 = vrot.slane %v2272_v20, %v2358_v21  ;;  %v1018_v20 = vrot.slane %v2337_v44, %v2358_v21 }
0x10b9   :  { %1866 = vmatprep.mubr.msk.f32.mxu1 %vm2120_vm0, %v2121_v4 }
0x118b   :  { %v1115_v49 = vpop.f32.mrb[6].mxu1 }
0x118c   :  { %v1119_v50 = vadd.f32 %v1115_v49, %v232_v48  ;;  %v1852_v51 = vpop.f32.mrb[7].mxu1  ;;  %v752_v49 = vrot.slane %v2305_v62, %v2358_v21  ;;  %v487_v62 = vcombine.high %v486_v46, %v486_v46 }
0x118d   :  { %v491_v51 = vrot.slane %v486_v46, %v2363_v25 }
0x118e   :  { %2008 = vtanh.f32 %v1119_v50  ;;  %v1699_v53 = vmul.f32 -1.442695, %v1119_v50  ;;  %v753_v44 = vcombine.high %v752_v49, %v752_v49 }
0x1190   :  { %2010 = vpow2.f32 %v1699_v53  ;;  %v757_v53 = vrot.slane %v752_v49, %v2363_v25 }
0x1198   :  { %v2009_v52 = vpop.eup %2008 }
0x1199   :  { %1129 = vrot.lane.b32.xlu0 %v2009_v52, %s2113_s15 }
0x119a   :  { %v2011_v54 = vpop.eup %2010 }
0x119b   :  { %v1123_v55 = vadd.f32 1.0, %v2011_v54 }
0x119d   :  { %2012 = vrcp.f32 %v1123_v55  ;;  %v1023_v55 = vrot.slane %v1018_v20, %v2363_v25 }
0x11a7   :  { %v2013_v56 = vpop.eup %2012 }
0x11a8   :  { %v1127_v41 = vmul.f32 %v2013_v56, %v1004_v39 }
0x120b   :  { %v1130_v57 = vpop.permute.xlu0 %1129 }
0x120c   :  { %v1132_v58 = vmul.f32 %v2013_v56, %v1130_v57  ;;  %v495_v57 = vrot.slane %v487_v62, %v2363_v25 }
0x120e   :  { %1134 = vrot.lane.b32.xlu1 %v1132_v58, %s2113_s15  ;;  %v1019_v58 = vcombine.high %v1018_v20, %v1018_v20 }
0x1280   :  { %v1135_v60 = vpop.permute.xlu1 %1134 }
0x1281   :  { %v1137_v61 = vadd.f32 %v1135_v60, %v1127_v41  ;;  %v761_v60 = vrot.slane %v753_v44, %v2363_v25 }
0x1283   :  { %2014 = vtanh.f32 %v1137_v61 }
0x128d   :  { %v2015_v63 = vpop.eup %2014 }
0x128e   :  { %1140 = vrot.lane.b32.xlu0 %v2015_v63, %s2113_s15 }
0x1300   :  { %v1141_v2 = vpop.permute.xlu0 %1140 }
0x1301   :  { %v1143_v3 = vmul.f32 %v2013_v56, %v1141_v2 }
0x1303   :  { %v1177_v5 = vrot.slane %v1143_v3, %v2215_v14  ;;  %v1151_v59 = vrot.slane %v1143_v3, %v2358_v21 }
0x1305   :  { %1178 = vrot.lane.b32.xlu1 %v1177_v5, %s2122_s3  ;;  %v1156_v42 = vrot.slane %v1151_v59, %v2363_v25  ;;  %v1152_v36 = vcombine.high %v1151_v59, %v1151_v59 }
0x1307   :  { %v1160_v34 = vrot.slane %v1152_v36, %v2363_v25 }
0x1377   :  { %v1179_v7 = vpop.permute.xlu1 %1178 }
0x1378   :  { %1862 = vmatmul.mubr.msk.f32.vlgmr.msra.gmra.mrb[8].mxu0 %vm119_vm1, %v1179_v7 }
0x1379   :  { %1882 = vmatprep.mubr.msk.f32.mxu0 %vm2120_vm0, %v2121_v4 }
0x144b   :  { %v1248_v9 = vpop.f32.mrb[8].mxu0 }
0x144c   :  { %v1252_v10 = vadd.f32 %v1248_v9, %v234_v8  ;;  %v1863_v11 = vpop.f32.mrb[9].mxu0 }
0x144e   :  { %2016 = vtanh.f32 %v1252_v10  ;;  %v1701_v13 = vmul.f32 -1.442695, %v1252_v10 }
0x1450   :  { %2018 = vpow2.f32 %v1701_v13 }
0x1458   :  { %v2017_v12 = vpop.eup %2016 }
0x1459   :  { %1262 = vrot.lane.b32.xlu0 %v2017_v12, %s2113_s15 }
0x145a   :  { %v2019_v15 = vpop.eup %2018 }
0x145b   :  { %v1256_v14 = vadd.f32 1.0, %v2019_v15 }
0x145d   :  { %2020 = vrcp.f32 %v1256_v14 }
0x1467   :  { %v2360_v22 = vpop.eup %2020 }
0x1468   :  { %v1260_v38 = vmul.f32 %v2360_v22, %v1137_v61  ;;  %v1027_v61 = vrot.slane %v1019_v58, %v2363_v25 }
0x14cb   :  { %v1263_v23 = vpop.permute.xlu0 %1262 }
0x14cc   :  { %v1265_v27 = vmul.f32 %v2360_v22, %v1263_v23 }
0x14ce   :  { %1267 = vrot.lane.b32.xlu1 %v1265_v27, %s2113_s15 }
0x14d2   :  { %362 = vrot.lane.b32.xlu1 %v357_v29, %s2122_s3 }
0x14d6   :  { %629 = vrot.lane.b32.xlu1 %v624_v6, %s2122_s3 }
0x14da   :  { %895 = vrot.lane.b32.xlu1 %v890_v31, %s2122_s3 }
0x14de   :  { %1161 = vrot.lane.b32.xlu1 %v1156_v42, %s2122_s3 }
0x14e2   :  { %364 = vrot.lane.b32.xlu1 %v361_v33, %s2122_s3 }
0x14e6   :  { %631 = vrot.lane.b32.xlu1 %v628_v35, %s2122_s3 }
0x14ea   :  { %897 = vrot.lane.b32.xlu1 %v894_v37, %s2122_s3 }
0x14ee   :  { %1163 = vrot.lane.b32.xlu1 %v1160_v34, %s2122_s3 }
0x1540   :  { %v1268_v39 = vpop.permute.xlu1 %1267 }
0x1541   :  { %v1270_v40 = vadd.f32 %v1268_v39, %v1260_v38 }
0x1543   :  { %2022 = vtanh.f32 %v1270_v40  ;;  %v1702_v40 = vld [vmem:[%s2520_s4] ss:$0 sm:$0xff] }
0x1544   :  { %v363_v43 = vpop.permute.xlu1 %362 }
0x1545   :  { %369 = vst.msk [vmem:[#allocation2] sm:$0x1] %vm368_vm2, %v363_v43  ;;  %371 = vst.msk [vmem:[#allocation3 + $0x7] sm:$0x1] %vm368_vm2, %v363_v43 }
0x1548   :  { %v630_v45 = vpop.permute.xlu1 %629 }
0x1549   :  { %635 = vst.msk [vmem:[#allocation2 + $0x2] sm:$0x1] %vm368_vm2, %v630_v45  ;;  %637 = vst.msk [vmem:[#allocation3 + $0x5] sm:$0x1] %vm368_vm2, %v630_v45  ;;  %v1703_v45 = vld [vmem:[%s2521_s5] ss:$0 sm:$0xff] }
0x154c   :  { %v896_v47 = vpop.permute.xlu1 %895 }
0x154d   :  { %v2023_v48 = vpop.eup %2022  ;;  %901 = vst.msk [vmem:[#allocation2 + $0x4] sm:$0x1] %vm368_vm2, %v896_v47  ;;  %903 = vst.msk [vmem:[#allocation3 + $0x3] sm:$0x1] %vm368_vm2, %v896_v47 }
0x154e   :  { %1273 = vrot.lane.b32.xlu0 %v2023_v48, %s2113_s15 }
0x1550   :  { %v1162_v50 = vpop.permute.xlu1 %1161 }
0x1551   :  { %1167 = vst.msk [vmem:[#allocation2 + $0x6] sm:$0x1] %vm368_vm2, %v1162_v50  ;;  %1169 = vst.msk [vmem:[#allocation3 + $0x1] sm:$0x1] %vm368_vm2, %v1162_v50 }
0x1552   :  { %496 = vrot.lane.b32.xlu0 %v491_v51, %s2122_s3 }
0x1554   :  { %v365_v52 = vpop.permute.xlu1 %364 }
0x1555   :  { %370 = vst.msk [vmem:[#allocation2 + $0x8] sm:$0x1] %vm368_vm2, %v365_v52  ;;  %372 = vst.msk [vmem:[#allocation3 + $0xf] sm:$0x1] %vm368_vm2, %v365_v52 }
0x1556   :  { %762 = vrot.lane.b32.xlu0 %v757_v53, %s2122_s3 }
0x1558   :  { %v632_v54 = vpop.permute.xlu1 %631 }
0x1559   :  { %636 = vst.msk [vmem:[#allocation2 + $0xa] sm:$0x1] %vm368_vm2, %v632_v54  ;;  %638 = vst.msk [vmem:[#allocation3 + $0xd] sm:$0x1] %vm368_vm2, %v632_v54 }
0x155a   :  { %1028 = vrot.lane.b32.xlu0 %v1023_v55, %s2122_s3 }
0x155c   :  { %v898_v56 = vpop.permute.xlu1 %897 }
0x155d   :  { %902 = vst.msk [vmem:[#allocation2 + $0xc] sm:$0x1] %vm368_vm2, %v898_v56  ;;  %904 = vst.msk [vmem:[#allocation3 + $0xb] sm:$0x1] %vm368_vm2, %v898_v56 }
0x155e   :  { %498 = vrot.lane.b32.xlu0 %v495_v57, %s2122_s3 }
0x1560   :  { %v1164_v41 = vpop.permute.xlu1 %1163 }
0x1561   :  { %1168 = vst.msk [vmem:[#allocation2 + $0xe] sm:$0x1] %vm368_vm2, %v1164_v41  ;;  %1170 = vst.msk [vmem:[#allocation3 + $0x9] sm:$0x1] %vm368_vm2, %v1164_v41 }
0x1562   :  { %764 = vrot.lane.b32.xlu0 %v761_v60, %s2122_s3 }
0x1566   :  { %1030 = vrot.lane.b32.xlu0 %v1027_v61, %s2122_s3 }
0x15c0   :  { %v1274_v63 = vpop.permute.xlu0 %1273 }
0x15c1   :  { %v1276_v2 = vmul.f32 %v2360_v22, %v1274_v63 }
0x15c3   :  { %v1284_v3 = vrot.slane %v1276_v2, %v2358_v21 }
0x15c4   :  { %v497_v5 = vpop.permute.xlu0 %496 }
0x15c5   :  { %v1285_v7 = vcombine.high %v1284_v3, %v1284_v3  ;;  %502 = vst.msk [vmem:[#allocation2 + $0x1] sm:$0x1] %vm368_vm2, %v497_v5  ;;  %504 = vst.msk [vmem:[#allocation3 + $0x6] sm:$0x1] %vm368_vm2, %v497_v5  ;;  %v1289_v8 = vrot.slane %v1284_v3, %v2363_v25 }
0x15c7   :  { %1294 = vrot.lane.b32.xlu0 %v1289_v8, %s2122_s3  ;;  %v1293_v10 = vrot.slane %v1285_v7, %v2363_v25 }
0x15c8   :  { %v763_v9 = vpop.permute.xlu0 %762 }
0x15c9   :  { %768 = vst.msk [vmem:[#allocation2 + $0x3] sm:$0x1] %vm368_vm2, %v763_v9  ;;  %770 = vst.msk [vmem:[#allocation3 + $0x4] sm:$0x1] %vm368_vm2, %v763_v9 }
0x15cb   :  { %1296 = vrot.lane.b32.xlu0 %v1293_v10, %s2122_s3 }
0x15cc   :  { %v1029_v11 = vpop.permute.xlu0 %1028 }
0x15cd   :  { %1034 = vst.msk [vmem:[#allocation2 + $0x5] sm:$0x1] %vm368_vm2, %v1029_v11  ;;  %1036 = vst.msk [vmem:[#allocation3 + $0x2] sm:$0x1] %vm368_vm2, %v1029_v11 }
0x15d0   :  { %v499_v12 = vpop.permute.xlu0 %498 }
0x15d1   :  { %503 = vst.msk [vmem:[#allocation2 + $0x9] sm:$0x1] %vm368_vm2, %v499_v12  ;;  %505 = vst.msk [vmem:[#allocation3 + $0xe] sm:$0x1] %vm368_vm2, %v499_v12 }
0x15d4   :  { %v765_v13 = vpop.permute.xlu0 %764 }
0x15d5   :  { %769 = vst.msk [vmem:[#allocation2 + $0xb] sm:$0x1] %vm368_vm2, %v765_v13  ;;  %771 = vst.msk [vmem:[#allocation3 + $0xc] sm:$0x1] %vm368_vm2, %v765_v13 }
0x15d8   :  { %v1031_v15 = vpop.permute.xlu0 %1030 }
0x15d9   :  { %1035 = vst.msk [vmem:[#allocation2 + $0xd] sm:$0x1] %vm368_vm2, %v1031_v15  ;;  %1037 = vst.msk [vmem:[#allocation3 + $0xa] sm:$0x1] %vm368_vm2, %v1031_v15 }
0x1639   :  { %v1295_v14 = vpop.permute.xlu0 %1294 }
0x163a   :  { %1300 = vst.msk [vmem:[#allocation2 + $0x7] sm:$0x1] %vm368_vm2, %v1295_v14  ;;  %1302 = vst.msk [vmem:[#allocation3] sm:$0x1] %vm368_vm2, %v1295_v14 }
0x163d   :  { %v1297_v18 = vpop.permute.xlu0 %1296 }
0x163e   :  { %1301 = vst.msk [vmem:[#allocation2 + $0xf] sm:$0x1] %vm368_vm2, %v1297_v18  ;;  %1303 = vst.msk [vmem:[#allocation3 + $0x8] sm:$0x1] %vm368_vm2, %v1297_v18 }
0x1641   :  { %v1307_v19 = vld [vmem:[#allocation2] sm:$0xff]  ;;  %v1309_v21 = vld [vmem:[#allocation3] sm:$0xff] }
0x1642   :  { %v1311_v22 = vsel %vm1306_vm3, %v1307_v19, %v1309_v21 }
0x1643   :  { %v1313_v23 = vsel %vm119_vm1, %v1311_v22, 0.0 }
0x1644   :  { %1314 = vadd.xlane.f32.xlu1 %v1313_v23 }
0x1645   :  { %v1308_v25 = vld [vmem:[#allocation2 + $0x8] sm:$0xff]  ;;  %v1310_v26 = vld [vmem:[#allocation3 + $0x8] sm:$0xff] }
0x1646   :  { %v1312_v27 = vsel %vm1306_vm3, %v1308_v25, %v1310_v26  ;;  %v1566_v26 = vld [vmem:[%s2522_s6] sm:$0xff] }
0x1647   :  { %v1316_v28 = vsel %vm119_vm1, %v1312_v27, 0.0 }
0x1648   :  { %1317 = vadd.xlane.f32.xlu0 %v1316_v28 }
0x16d1   :  { %v1315_v29 = vpop.xlane.xlu1 %1314 }
0x16d2   :  { %v1320_v0 = vmul.f32 0.03125, %v1315_v29 }
0x16d4   :  { %v1322_v30 = vsub.f32 %v1311_v22, %v1320_v0 }
0x16d5   :  { %v1318_v6 = vpop.xlane.xlu0 %1317 }
0x16d6   :  { %v1321_v59 = vmul.f32 0.03125, %v1318_v6  ;;  %v1324_v31 = vmul.f32 %v1322_v30, %v1322_v30  ;;  %v1568_v6 = vld [vmem:[%s2522_s6 + $0x10] sm:$0xff] }
0x16d8   :  { %v1323_v32 = vsub.f32 %v1312_v27, %v1321_v59  ;;  %v1326_v42 = vsel %vm119_vm1, %v1324_v31, 0.0  ;;  %v1567_v27 = vld [vmem:[%s2522_s6 + $0x8] sm:$0xff]  ;;  %v1569_v59 = vld [vmem:[%s2522_s6 + $0x18] sm:$0xff] }
0x16d9   :  { %1327 = vadd.xlane.f32.xlu0 %v1326_v42  ;;  %v1942_v0 = vpack.c.bf16 %v1567_v27, %v1566_v26 }
0x16da   :  { %v1325_v16 = vmul.f32 %v1323_v32, %v1323_v32 }
0x16db   :  { %1943 = vmatpush3.bf16.msra.mxu0 %v1942_v0 }
0x16dc   :  { %v1329_v33 = vsel %vm119_vm1, %v1325_v16, 0.0  ;;  %1944 = vmatprep.subr.bf16.mxu0 %v2118_v1 }
0x16dd   :  { %1330 = vadd.xlane.f32.xlu1 %v1329_v33 }
0x1766   :  { %v1328_v24 = vpop.xlane.xlu0 %1327 }
0x1767   :  { %v1332_v35 = vmul.f32 0.03125, %v1328_v24 }
0x1769   :  { %v1334_v36 = vadd.f32 1e-05, %v1332_v35 }
0x176a   :  { %v1331_v37 = vpop.xlane.xlu1 %1330 }
0x176b   :  { %2024 = vrsqrt.f32 %v1334_v36  ;;  %v1333_v34 = vmul.f32 0.03125, %v1331_v37 }
0x176d   :  { %v1335_v38 = vadd.f32 1e-05, %v1333_v34 }
0x176f   :  { %2026 = vrsqrt.f32 %v1335_v38 }
0x1775   :  { %v2025_v39 = vpop.eup %2024 }
0x1776   :  { %v1338_v43 = vmul.f32 %v2025_v39, %v1322_v30 }
0x1778   :  { %v1347_v46 = vmul.f32 %v1702_v40, %v1338_v43 }
0x1779   :  { %v2027_v47 = vpop.eup %2026 }
0x177a   :  { %v1339_v48 = vmul.f32 %v2027_v47, %v1323_v32  ;;  %v2459_v49 = vadd.f32 %v1703_v45, %v1347_v46  ;;  %v1945_v32 = vpack.c.bf16 %v1569_v59, %v1568_v6 }
0x177c   :  { %1865 = vmatpush3.xpose.msk.msra.mxu1 %vm119_vm1, %v2459_v49  ;;  %v1348_v50 = vmul.f32 %v1702_v40, %v1339_v48  ;;  %1946 = vmatpush3.bf16.msra.mxu0 %v1945_v32 }
0x177d   :  { %1869 = vmatprep.subr.mxu1 %v2121_v4 }
0x177e   :  { %v2464_v51 = vadd.f32 %v1703_v45, %v1348_v50 }
0x177f   :  { %1867 = vmatmul.mubr.msk.f32.vlgmr.msra.gmra.mrb[8].mxu1 %vm119_vm1, %v2459_v49 }
0x1780   :  { %1870 = vmatpush3.xpose.msk.msra.mxu1 %vm119_vm1, %v2464_v51  ;;  %1871 = vmatprep.mubr.msk.f32.mxu1 %vm2120_vm0, %v2121_v4 }
0x1783   :  { %1872 = vmatmul.mubr.msk.f32.vlgmr.msra.gmra.mrb[10].mxu1 %vm119_vm1, %v2464_v51 }
0x1852   :  { %v1427_v20 = vpop.f32.mrb[8].mxu1 }
0x1853   :  { %v1505_v52 = vmul.f32 0.17677669, %v1427_v20  ;;  %v1868_v53 = vpop.f32.mrb[9].mxu1 }
0x1855   :  { %v1508_v62 = vsel %vm1507_vm4, %v1505_v52, -inf }
0x1856   :  { %1509 = vmax.xlane.f32.xlu0 %v1508_v62  ;;  %v1500_v54 = vpop.f32.mrb[10].mxu1 }
0x1857   :  { %v1506_v55 = vmul.f32 0.17677669, %v1500_v54  ;;  %v1873_v44 = vpop.f32.mrb[11].mxu1 }
0x1859   :  { %v1511_v56 = vsel %vm1507_vm4, %v1506_v55, -inf }
0x185a   :  { %1512 = vmax.xlane.f32.xlu1 %v1511_v56 }
0x18e3   :  { %v1510_v57 = vpop.xlane.xlu0 %1509 }
0x18e4   :  { %v1514_v58 = vsub.f32 %v1505_v52, %v1510_v57 }
0x18e6   :  { %v1516_v41 = vmul.f32 1.442695, %v1514_v58 }
0x18e7   :  { %v1513_v4 = vpop.xlane.xlu1 %1512 }
0x18e8   :  { %2028 = vpow2.f32 %v1516_v41  ;;  %v1515_v60 = vsub.f32 %v1506_v55, %v1513_v4 }
0x18ea   :  { %v1518_v61 = vmul.f32 1.442695, %v1515_v60 }
0x18ec   :  { %2030 = vpow2.f32 %v1518_v61 }
0x18f2   :  { %v2029_v63 = vpop.eup %2028 }
0x18f3   :  { %v1520_v2 = vsel %vm1507_vm4, %v2029_v63, 0.0 }
0x18f4   :  { %1521 = vadd.xlane.f32.xlu0 %v1520_v2 }
0x18f6   :  { %v2031_v3 = vpop.eup %2030 }
0x18f7   :  { %v1523_v5 = vsel %vm1507_vm4, %v2031_v3, 0.0 }
0x18f8   :  { %1524 = vadd.xlane.f32.xlu1 %v1523_v5 }
0x1981   :  { %v1522_v7 = vpop.xlane.xlu0 %1521 }
0x1982   :  { %2032 = vrcp.f32 %v1522_v7 }
0x1985   :  { %v1525_v8 = vpop.xlane.xlu1 %1524 }
0x1986   :  { %2034 = vrcp.f32 %v1525_v8 }
0x198c   :  { %v2033_v9 = vpop.eup %2032 }
0x198d   :  { %v1527_v10 = vmul.f32 %v2033_v9, %v2029_v63 }
0x198f   :  { %v1530_v11 = vsel %vm1507_vm4, %v1527_v10, 0.0 }
0x1990   :  { %v2035_v12 = vpop.eup %2034  ;;  %v1531_v13 = vrot.slane %v1530_v11, 4 }
0x1991   :  { %v1529_v15 = vmul.f32 %v2035_v12, %v2031_v3 }
0x1992   :  { %v1532_v14 = vadd.f32 %v1531_v13, %v1530_v11 }
0x1993   :  { %v1537_v17 = vsel %vm1507_vm4, %v1529_v15, 0.0 }
0x1994   :  { %v1533_v18 = vrot.slane %v1532_v14, 2  ;;  %v1538_v19 = vrot.slane %v1537_v17, 4 }
0x1996   :  { %v1534_v21 = vadd.f32 %v1533_v18, %v1532_v14  ;;  %v1539_v22 = vadd.f32 %v1538_v19, %v1537_v17 }
0x1998   :  { %v1535_v23 = vrot.slane %v1534_v21, 1  ;;  %v1540_v25 = vrot.slane %v1539_v22, 2 }
0x199a   :  { %v1536_v28 = vadd.f32 %v1535_v23, %v1534_v21  ;;  %v1541_v29 = vadd.f32 %v1540_v25, %v1539_v22 }
0x199c   :  { %1545 = vbcast.lane.b32.xlu0 %v1536_v28, 256  ;;  %v1542_v30 = vrot.slane %v1541_v29, 1 }
0x199e   :  { %v1543_v31 = vadd.f32 %v1542_v30, %v1541_v29 }
0x19a0   :  { %1548 = vbcast.lane.b32.xlu1 %v1543_v31, 256 }
0x1a0e   :  { %v1546_v42 = vpop.permute.xlu0 %1545 }
0x1a0f   :  { %v1550_v16 = vmul.f32 %v1546_v42, %v2459_v49 }
0x1a11   :  { %v1552_v33 = vsel %vm119_vm1, %v1550_v16, 0.0 }
0x1a12   :  { %v1553_v24 = vrot.slane %v1552_v33, 4  ;;  %v1549_v35 = vpop.permute.xlu1 %1548 }
0x1a13   :  { %v1551_v1 = vmul.f32 %v1549_v35, %v2464_v51  ;;  %v1708_v51 = vld [vmem:[%s2523_s7] ss:$0 sm:$0xff]  ;;  %s2124_s7 = smov [#allocation9]  }
0x1a14   :  { %v1554_v36 = vadd.f32 %v1553_v24, %v1552_v33  ;;  %s1674_s0 = sshll.u32 %s2124_s7, 4  ;;  %s1675_s0 = int_to_ptr.vmem [resolvable:$true] %s1674_s0 }
0x1a15   :  { %v1559_v37 = vsel %vm119_vm1, %v1551_v1, 0.0  ;;  %s2084_s28 = scalar_lea.vmem %s1675_s0, 32  ;;  %p2089_p3 = scmp.lt.s32.totalorder %s1675_s0, %s1675_s0 }
0x1a16   :  { %v1555_v34 = vrot.slane %v1554_v36, 2  ;;  %v1560_v38 = vrot.slane %v1559_v37, 4  ;;  %p2085_p2 = scmp.ne.s32.totalorder %s1675_s0, %s2084_s28  ;;  %p2090_p4 = scmp.lt.s32.totalorder %s2084_s28, %s2084_s28 }
0x1a18   :  { %v1556_v39 = vadd.f32 %v1555_v34, %v1554_v36  ;;  %v1561_v40 = vadd.f32 %v1560_v38, %v1559_v37  ;;  %p2091_p5 = por %p2090_p4, %p2089_p3 }
0x1a1a   :  { %v1562_v43 = vrot.slane %v1561_v40, 2  ;;  %v1557_v45 = vrot.slane %v1556_v39, 1  ;;  %p2092_p6 = pnand %p2091_p5, %p2085_p2 }
0x1a1c   :  { %v1563_v46 = vadd.f32 %v1562_v43, %v1561_v40  ;;  %v1558_v48 = vadd.f32 %v1557_v45, %v1556_v39 }
0x1a1e   :  { %v1564_v47 = vrot.slane %v1563_v46, 1 }
0x1a20   :  { %v1565_v49 = vadd.f32 %v1564_v47, %v1563_v46 }
0x1a22   :  { %v1580_v50 = vsel %vm1579_vm5, %v1565_v49, %v1558_v48 }
0x1a23   :  { %1883 = vmatmul.mubr.msk.f32.vlgmr.msra.gmra.mrb[10].mxu0 %vm119_vm1, %v1580_v50 }
0x1af6   :  { %v1649_v20 = vpop.f32.mrb[10].mxu0 }
0x1af7   :  { %v1650_v52 = vadd.f32 %v1708_v51, %v1649_v20  ;;  %v1884_v53 = vpop.f32.mrb[11].mxu0 }
0x1af9   :  { %v1654_v62 = vsel %vm1653_vm6, %v1650_v52, -inf }
0x1afa   :  { %1655 = vmax.xlane.f32.xlu1 %v1654_v62 }
0x1b87   :  { %v1656_v54 = vpop.xlane.xlu1 %1655 }
0x1b88   :  { %v1657_v55 = vsub.f32 %v1650_v52, %v1656_v54 }
0x1b8a   :  { %v1658_v44 = vmul.f32 1.442695, %v1657_v55 }
0x1b8c   :  { %2036 = vpow2.f32 %v1658_v44 }
0x1b96   :  { %v2037_v56 = vpop.eup %2036 }
0x1b97   :  { %v1660_v57 = vsel %vm1653_vm6, %v2037_v56, 0.0 }
0x1b98   :  { %1661 = vadd.xlane.f32.xlu0 %v1660_v57 }
0x1c25   :  { %v1662_v58 = vpop.xlane.xlu0 %1661 }
0x1c26   :  { %2038 = vlog2.f32 %v1662_v58 }
0x1c30   :  { %v2039_v41 = vpop.eup %2038 }
0x1c31   :  { %v1664_v4 = vmul.f32 0.6931472, %v2039_v41 }
0x1c33   :  { %v1665_v60 = vadd.f32 %v1664_v4, %v1656_v54 }
0x1c35   :  { %v1666_v61 = vsub.f32 %v1650_v52, %v1665_v60 }
0x1c37   :  { %1667 = vst.msk [vmem:[#allocation9] sm:$0x3] %vm1653_vm6, %v1666_v61 }
0x1c38   :  { %2095 = shalt.err (!%p2092_p6)
}
0x1c39   :  { %s2096_s2 = scalar_lea.hbm %s2524_s8, 32 }
0x1c3a   :  { %p2097_p7 = scmp.ne.s32.totalorder %s2524_s8, %s2096_s2  ;;  %p2100_p8 = scmp.lt.u32.totalorder %s2096_s2, %s2524_s8 }
0x1c3c   :  { %p2102_p9 = pnand %p2100_p8, %p2097_p7 }
0x1c3e   :  { %2105 = shalt.err (!%p2102_p9)
}
0x1c3f   :  { %1677 = dma.vmem_to_hbm [thread:$0]  %s1675_s0, 32, %s2524_s8, [#allocation6]  }
0x1c40   :  { %2110 = dma.done.wait [#allocation6], 32  }
0x1c41   :  { %2111 = vsyncadd [#allocation6], 4294967264 }
0x1c42   :  { %1681 = vsyncpa [#allocation5], 1 }
0x1c43   :  { %1682 = vsyncpa [#allocation8], 1 }
0x1c44   :  { %1683 = vsyncpa [#allocation6], 1 }

</bundles_post_ra>
